<compile_context>
chip_gen: v5e
topology: v5e:2x2
jax: 0.10.0
libtpu: 0.0.40
codegen_flags: <defaults>
</compile_context>

<pallas_src>
import functools

import jax
import jax.numpy as jnp
from jax.experimental import pallas as pl
from jax.experimental.pallas import tpu as pltpu


# ----------------------------- Config (small, deterministic) -----------------
class Config:
    n_embd = 16
    n_hidden = 32
    n_layers = 2
    dropout = 0.2   # eval mode -> no-op (matches PyTorch inference forward)


# ----------------------------- Fused forward kernel --------------------------
def _fused_name_generator_kernel(ids_ref, emb_ref, wih1_ref, wrec_ref, bf_ref,
                                 h0_ref, c0_ref, fcw_ref, fcb_ref,
                                 logits_ref, hn_ref, cn_ref,
                                 *, B, T, H, V):
    """Fused gate layout (G = 8H lanes, gate-major, layers interleaved):
         [ i1 | i2 | f1 | f2 | g1 | g2 | o1 | o2 ]   each block H lanes
       Packed state layout: [ layer1 | layer2 ]  (B, 2H)."""
    G = 8 * H

    # ---- Embedding lookup as one-hot MXU matmul (exact row select) -----------
    # rows are time-major: row t*B + b holds token (b, t)
    ids = ids_ref[...]                                                     # (T*B, 1) i32
    onehot = (ids == jax.lax.broadcasted_iota(jnp.int32, (T * B, V), 1)
              ).astype(jnp.float32)                                        # (T*B, V)
    x = jnp.dot(onehot, emb_ref[...], preferred_element_type=jnp.float32)  # (T*B, E)

    # ---- Hoisted, time-invariant layer-1 input projection + both biases ------
    xp = jnp.dot(x, wih1_ref[...],
                 preferred_element_type=jnp.float32) + bf_ref[...]         # (T*B, 8H)

    wrec = wrec_ref[...]                                                   # (2H, 8H)

    # ---- Hoisted lane masks ---------------------------------------------------
    lane = jax.lax.broadcasted_iota(jnp.int32, (B, G), 1)
    tanh_mask = (lane >= 4 * H) & (lane < 6 * H)          # g-gate lanes of both layers
    l1_mask = jax.lax.broadcasted_iota(jnp.int32, (B, 2 * H), 1) < H

    # ---- Packed states [layer1 | layer2] --------------------------------------
    h_both = jnp.concatenate([h0_ref[0], h0_ref[1]], axis=1)               # (B, 2H)
    c_both = jnp.concatenate([c0_ref[0], c0_ref[1]], axis=1)               # (B, 2H)

    # ---- Wavefront recurrence: step s does layer-1 t=s and layer-2 t=s-1 ------
    ys = []                          # packed per-step outputs; layer-2 half feeds the FC
    for s in range(T + 1):           # static -> fully unrolled
        t1 = min(s, T - 1)           # layer-1 timestep (dummy reuse at s == T)
        g = xp[t1 * B:(t1 + 1) * B, :] + jnp.dot(
            h_both, wrec, preferred_element_type=jnp.float32)              # (B, 8H)
        act = jnp.where(tanh_mask, jnp.tanh(g), jax.nn.sigmoid(g))         # full-width EUP
        i_b = act[:, 0 * H:2 * H]    # [i1 | i2]
        f_b = act[:, 2 * H:4 * H]    # [f1 | f2]
        g_b = act[:, 4 * H:6 * H]    # [g1 | g2]
        o_b = act[:, 6 * H:8 * H]    # [o1 | o2]
        c_new = f_b * c_both + i_b * g_b
        h_new = o_b * jnp.tanh(c_new)
        if s == 0:                   # layer-2 "step -1" doesn't exist: keep its state
            c_both = jnp.where(l1_mask, c_new, c_both)
            h_both = jnp.where(l1_mask, h_new, h_both)
        elif s == T:                 # layer-1 "step T" doesn't exist: keep its state
            c_both = jnp.where(l1_mask, c_both, c_new)
            h_both = jnp.where(l1_mask, h_both, h_new)
        else:
            c_both = c_new
            h_both = h_new
        if s >= 1:                   # lanes [H:2H] now hold layer-2 output for t = s-1
            ys.append(h_both)

    # ---- FC epilogue: packed activations @ zero-row-padded FC weight ----------
    y = jnp.concatenate(ys, axis=0)                                        # (T*B, 2H)
    logits_ref[...] = (jnp.dot(y, fcw_ref[...],
                               preferred_element_type=jnp.float32)
                       + fcb_ref[...])                                     # (T*B, Vp)

    # ---- Final hidden / cell states -------------------------------------------
    hn_ref[0] = h_both[:, 0:H]
    hn_ref[1] = h_both[:, H:2 * H]
    cn_ref[0] = c_both[:, 0:H]
    cn_ref[1] = c_both[:, H:2 * H]


# ----------------------------- Full model forward ----------------------------
def name_generator_forward(params, x_ids, hidden=None):
    """x_ids: (B, T) int32 token ids. Returns (logits (B,T,V), (h_n, c_n))."""
    B, T = x_ids.shape
    H = Config.n_hidden
    E = Config.n_embd
    L = Config.n_layers
    assert L == 2, "fused wavefront kernel is specialized for the 2-layer config"
    V = params["emb"].shape[0]
    Vp = -(-V // 128) * 128          # lane-dense logits width (unmasked stores)

    if hidden is None:
        h0 = jnp.zeros((L, B, H), jnp.float32)
        c0 = jnp.zeros((L, B, H), jnp.float32)
    else:
        h0, c0 = hidden

    # ---- Build fused gate-major weights (tiny, one-time glue under jit) -------
    p0, p1 = params["lstm"][0], params["lstm"][1]
    gc = lambda w: [w[:, k * H:(k + 1) * H] for k in range(4)]   # split i,f,g,o columns
    wi1, wh1, b1 = gc(p0["wih_t"]), gc(p0["whh_t"]), gc(p0["b"])
    wi2, wh2, b2 = gc(p1["wih_t"]), gc(p1["whh_t"]), gc(p1["b"])
    zE = jnp.zeros((E, H), jnp.float32)
    zH = jnp.zeros((H, H), jnp.float32)
    interleave = lambda a, b: sum([[a[k], b[k]] for k in range(4)], [])
    # layer-1 input projection in fused layout (layer-2 columns zero)
    wih1_f = jnp.concatenate(interleave(wi1, [zE] * 4), axis=1)            # (E, 8H)
    # fused recurrent weights: rows [h1 ; h2]
    top = jnp.concatenate(interleave(wh1, wi2), axis=1)                    # (H, 8H)
    bot = jnp.concatenate(interleave([zH] * 4, wh2), axis=1)               # (H, 8H)
    wrec_f = jnp.concatenate([top, bot], axis=0)                           # (2H, 8H)
    b_f = jnp.concatenate(interleave(b1, b2), axis=1)                      # (1, 8H)

    # FC weight: zero rows for the layer-1 half of the packed state, Vp lane-dense cols
    fc_w_pad = jnp.zeros((2 * H, Vp), jnp.float32).at[H:, :V].set(params["fc_w_t"])
    fc_b_pad = jnp.zeros((1, Vp), jnp.float32).at[:, :V].set(params["fc_b"])

    # Tiny glue (64 bytes): flatten ids time-major as a column for the in-kernel one-hot.
    ids_col = jnp.transpose(x_ids).reshape(T * B, 1).astype(jnp.int32)

    inputs = [ids_col, params["emb"], wih1_f, wrec_f, b_f, h0, c0, fc_w_pad, fc_b_pad]
    kernel = functools.partial(_fused_name_generator_kernel, B=B, T=T, H=H, V=V)

    logits_pad, h_n, c_n = pl.pallas_call(
        kernel,
        out_shape=(
            jax.ShapeDtypeStruct((T * B, Vp), jnp.float32),   # logits, time-major, padded
            jax.ShapeDtypeStruct((L, B, H), jnp.float32),     # h_n
            jax.ShapeDtypeStruct((L, B, H), jnp.float32),     # c_n
        ),
        in_specs=[pl.BlockSpec(memory_space=pltpu.MemorySpace.VMEM)] * len(inputs),
        out_specs=(
            pl.BlockSpec(memory_space=pltpu.MemorySpace.VMEM),
            pl.BlockSpec(memory_space=pltpu.MemorySpace.VMEM),
            pl.BlockSpec(memory_space=pltpu.MemorySpace.VMEM),
        ),
    )(*inputs)

    # Tiny glue: drop lane padding, time-major (T*B, V) -> batch-first (B, T, V).
    logits = logits_pad[:, :V].reshape(T, B, V).transpose(1, 0, 2)
    return logits, (h_n, c_n)


# ----------------------------- Parameter init (deterministic) ----------------
def init_params(key, vocab_size):
    H, E, L = Config.n_hidden, Config.n_embd, Config.n_layers
    k = 1.0 / jnp.sqrt(jnp.float32(H))
    keys = jax.random.split(key, 2 + 4 * L + 2)
    ki = iter(keys)

    emb = jax.random.normal(next(ki), (vocab_size, E), jnp.float32)

    lstm = []
    for layer in range(L):
        d_in = E if layer == 0 else H
        w_ih = jax.random.uniform(next(ki), (4 * H, d_in), jnp.float32, -k, k)
        w_hh = jax.random.uniform(next(ki), (4 * H, H), jnp.float32, -k, k)
        b_ih = jax.random.uniform(next(ki), (4 * H,), jnp.float32, -k, k)
        b_hh = jax.random.uniform(next(ki), (4 * H,), jnp.float32, -k, k)
        lstm.append({
            "wih_t": w_ih.T,                      # (d_in, 4H), columns [i|f|g|o]
            "whh_t": w_hh.T,                      # (H, 4H)
            "b": (b_ih + b_hh)[None, :],          # (1, 4H)
        })

    fc_w = jax.random.uniform(next(ki), (vocab_size, H), jnp.float32, -k, k)
    fc_b = jax.random.uniform(next(ki), (vocab_size,), jnp.float32, -k, k)

    return {"emb": emb, "lstm": lstm,
            "fc_w_t": fc_w.T, "fc_b": fc_b[None, :]}


# ----------------------------- Pure-JAX reference (for validation) -----------
def reference_forward(params, x_ids, hidden=None):
    B, T = x_ids.shape
    H, L = Config.n_hidden, Config.n_layers
    emb = jnp.take(params["emb"], x_ids, axis=0)
    x = jnp.transpose(emb, (1, 0, 2)).astype(jnp.float32)
    if hidden is None:
        h0 = jnp.zeros((L, B, H), jnp.float32)
        c0 = jnp.zeros((L, B, H), jnp.float32)
    else:
        h0, c0 = hidden
    h_fin, c_fin = [], []
    for layer in range(L):
        p = params["lstm"][layer]
        h, c = h0[layer], c0[layer]
        ys = []
        for t in range(T):
            g = x[t] @ p["wih_t"] + h @ p["whh_t"] + p["b"]
            i_g = jax.nn.sigmoid(g[:, 0 * H:1 * H])
            f_g = jax.nn.sigmoid(g[:, 1 * H:2 * H])
            g_g = jnp.tanh(g[:, 2 * H:3 * H])
            o_g = jax.nn.sigmoid(g[:, 3 * H:4 * H])
            c = f_g * c + i_g * g_g
            h = o_g * jnp.tanh(c)
            ys.append(h)
        x = jnp.stack(ys, 0)
        h_fin.append(h)
        c_fin.append(c)
    y = jnp.transpose(x, (1, 0, 2))
    logits = y @ params["fc_w_t"] + params["fc_b"]
    return logits, (jnp.stack(h_fin, 0), jnp.stack(c_fin, 0))


# ----------------------------- Main -------------------------------------------
if __name__ == "__main__":
    vocab_size = 32
    B, T = 2, 8

    key = jax.random.PRNGKey(0)
    k_param, k_data = jax.random.split(key)
    params = init_params(k_param, vocab_size)
    x_ids = jax.random.randint(k_data, (B, T), 0, vocab_size, dtype=jnp.int32)

    fwd = jax.jit(name_generator_forward)
    logits, (h_n, c_n) = fwd(params, x_ids)
    jax.block_until_ready((logits, h_n, c_n))

    ref_logits, (ref_h, ref_c) = reference_forward(params, x_ids)
    assert logits.shape == (B, T, vocab_size)
    assert h_n.shape == (Config.n_layers, B, Config.n_hidden)
    assert c_n.shape == (Config.n_layers, B, Config.n_hidden)
    assert jnp.allclose(logits, ref_logits, atol=1e-5, rtol=1e-5)
    assert jnp.allclose(h_n, ref_h, atol=1e-5, rtol=1e-5)
    assert jnp.allclose(c_n, ref_c, atol=1e-5, rtol=1e-5)

    print("KERNEL_OK")
</pallas_src>

<mosaic_0001>
module attributes {stable_mosaic.version = 11 : i64} {
  func.func @_fused_name_generator_kernel(%arg0: memref<16x1xi32, #tpu.memory_space<vmem>>, %arg1: memref<32x16xf32, #tpu.memory_space<vmem>>, %arg2: memref<16x256xf32, #tpu.memory_space<vmem>>, %arg3: memref<64x256xf32, #tpu.memory_space<vmem>>, %arg4: memref<1x256xf32, #tpu.memory_space<vmem>>, %arg5: memref<2x2x32xf32, #tpu.memory_space<vmem>>, %arg6: memref<2x2x32xf32, #tpu.memory_space<vmem>>, %arg7: memref<64x128xf32, #tpu.memory_space<vmem>>, %arg8: memref<1x128xf32, #tpu.memory_space<vmem>>, %arg9: memref<16x128xf32, #tpu.memory_space<vmem>>, %arg10: memref<2x2x32xf32, #tpu.memory_space<vmem>>, %arg11: memref<2x2x32xf32, #tpu.memory_space<vmem>>) attributes {dimension_semantics = [], scalar_prefetch = 0 : i64, scratch_operands = 0 : i64, tpu.core_type = #tpu.core_type<tc>} {
    %c0 = arith.constant 0 : index
    %c0_0 = arith.constant 0 : index
    %0 = vector.load %arg0[%c0, %c0_0] : memref<16x1xi32, #tpu.memory_space<vmem>>, vector<16x1xi32>
    %1 = tpu.iota {dimensions = array<i32: 1>} : vector<16x32xi32>
    %2 = vector.broadcast %0 : vector<16x1xi32> to vector<16x32xi32>
    %3 = arith.cmpi eq, %2, %1 : vector<16x32xi32>
    %4 = arith.extui %3 : vector<16x32xi1> to vector<16x32xi32>
    %5 = arith.sitofp %4 : vector<16x32xi32> to vector<16x32xf32>
    %c0_1 = arith.constant 0 : index
    %c0_2 = arith.constant 0 : index
    %6 = vector.load %arg1[%c0_1, %c0_2] : memref<32x16xf32, #tpu.memory_space<vmem>>, vector<32x16xf32>
    %cst = arith.constant dense<0.000000e+00> : vector<16x16xf32>
    %7 = tpu.matmul %5, %6, %cst {dimension_numbers = #tpu.dot_dimension_numbers<[1], [0], [0], [1], [0, 0, 1, 1], [], []>} : vector<16x32xf32>, vector<32x16xf32>, vector<16x16xf32> -> vector<16x16xf32>
    %c0_3 = arith.constant 0 : index
    %c0_4 = arith.constant 0 : index
    %8 = vector.load %arg2[%c0_3, %c0_4] : memref<16x256xf32, #tpu.memory_space<vmem>>, vector<16x256xf32>
    %cst_5 = arith.constant dense<0.000000e+00> : vector<16x256xf32>
    %9 = tpu.matmul %7, %8, %cst_5 {dimension_numbers = #tpu.dot_dimension_numbers<[1], [0], [0], [1], [0, 0, 1, 1], [], []>} : vector<16x16xf32>, vector<16x256xf32>, vector<16x256xf32> -> vector<16x256xf32>
    %c0_6 = arith.constant 0 : index
    %c0_7 = arith.constant 0 : index
    %10 = vector.load %arg4[%c0_6, %c0_7] : memref<1x256xf32, #tpu.memory_space<vmem>>, vector<1x256xf32>
    %11 = vector.broadcast %10 : vector<1x256xf32> to vector<16x256xf32>
    %12 = arith.addf %9, %11 : vector<16x256xf32>
    %c0_8 = arith.constant 0 : index
    %c0_9 = arith.constant 0 : index
    %13 = vector.load %arg3[%c0_8, %c0_9] : memref<64x256xf32, #tpu.memory_space<vmem>>, vector<64x256xf32>
    %14 = tpu.iota {dimensions = array<i32: 1>} : vector<2x256xi32>
    %c128_i32 = arith.constant 128 : i32
    %15 = vector.broadcast %c128_i32 : i32 to vector<2x256xi32>
    %16 = arith.cmpi sge, %14, %15 : vector<2x256xi32>
    %c192_i32 = arith.constant 192 : i32
    %17 = vector.broadcast %c192_i32 : i32 to vector<2x256xi32>
    %18 = arith.cmpi slt, %14, %17 : vector<2x256xi32>
    %19 = arith.andi %16, %18 : vector<2x256xi1>
    %20 = tpu.iota {dimensions = array<i32: 1>} : vector<2x64xi32>
    %c32_i32 = arith.constant 32 : i32
    %21 = vector.broadcast %c32_i32 : i32 to vector<2x64xi32>
    %22 = arith.cmpi slt, %20, %21 : vector<2x64xi32>
    %c0_10 = arith.constant 0 : index
    %c0_11 = arith.constant 0 : index
    %c0_12 = arith.constant 0 : index
    %23 = vector.load %arg5[%c0_10, %c0_11, %c0_12] : memref<2x2x32xf32, #tpu.memory_space<vmem>>, vector<1x2x32xf32>
    %24 = vector.shape_cast %23 : vector<1x2x32xf32> to vector<2x32xf32>
    %c1 = arith.constant 1 : index
    %c0_13 = arith.constant 0 : index
    %c0_14 = arith.constant 0 : index
    %25 = vector.load %arg5[%c1, %c0_13, %c0_14] : memref<2x2x32xf32, #tpu.memory_space<vmem>>, vector<1x2x32xf32>
    %26 = vector.shape_cast %25 : vector<1x2x32xf32> to vector<2x32xf32>
    %27 = tpu.concatenate %24, %26 in 1 : vector<2x32xf32>, vector<2x32xf32> -> vector<2x64xf32>
    %c0_15 = arith.constant 0 : index
    %c0_16 = arith.constant 0 : index
    %c0_17 = arith.constant 0 : index
    %28 = vector.load %arg6[%c0_15, %c0_16, %c0_17] : memref<2x2x32xf32, #tpu.memory_space<vmem>>, vector<1x2x32xf32>
    %29 = vector.shape_cast %28 : vector<1x2x32xf32> to vector<2x32xf32>
    %c1_18 = arith.constant 1 : index
    %c0_19 = arith.constant 0 : index
    %c0_20 = arith.constant 0 : index
    %30 = vector.load %arg6[%c1_18, %c0_19, %c0_20] : memref<2x2x32xf32, #tpu.memory_space<vmem>>, vector<1x2x32xf32>
    %31 = vector.shape_cast %30 : vector<1x2x32xf32> to vector<2x32xf32>
    %32 = tpu.concatenate %29, %31 in 1 : vector<2x32xf32>, vector<2x32xf32> -> vector<2x64xf32>
    %33 = vector.extract_strided_slice %12 {offsets = [0, 0], sizes = [2, 256], strides = [1, 1]} : vector<16x256xf32> to vector<2x256xf32>
    %cst_21 = arith.constant dense<0.000000e+00> : vector<2x256xf32>
    %34 = tpu.matmul %27, %13, %cst_21 {dimension_numbers = #tpu.dot_dimension_numbers<[1], [0], [0], [1], [0, 0, 1, 1], [], []>} : vector<2x64xf32>, vector<64x256xf32>, vector<2x256xf32> -> vector<2x256xf32>
    %35 = arith.addf %33, %34 : vector<2x256xf32>
    %36 = math.tanh %35 : vector<2x256xf32>
    %37 = arith.negf %35 : vector<2x256xf32>
    %38 = math.exp %37 : vector<2x256xf32>
    %cst_22 = arith.constant 1.000000e+00 : f32
    %39 = vector.broadcast %cst_22 : f32 to vector<2x256xf32>
    %40 = arith.addf %39, %38 : vector<2x256xf32>
    %41 = arith.divf %39, %40 : vector<2x256xf32>
    %42 = arith.select %19, %36, %41 : vector<2x256xi1>, vector<2x256xf32>
    %43 = vector.extract_strided_slice %42 {offsets = [0, 0], sizes = [2, 64], strides = [1, 1]} : vector<2x256xf32> to vector<2x64xf32>
    %44 = vector.extract_strided_slice %42 {offsets = [0, 64], sizes = [2, 64], strides = [1, 1]} : vector<2x256xf32> to vector<2x64xf32>
    %45 = vector.extract_strided_slice %42 {offsets = [0, 128], sizes = [2, 64], strides = [1, 1]} : vector<2x256xf32> to vector<2x64xf32>
    %46 = vector.extract_strided_slice %42 {offsets = [0, 192], sizes = [2, 64], strides = [1, 1]} : vector<2x256xf32> to vector<2x64xf32>
    %47 = arith.mulf %44, %32 : vector<2x64xf32>
    %48 = arith.mulf %43, %45 : vector<2x64xf32>
    %49 = arith.addf %47, %48 : vector<2x64xf32>
    %50 = math.tanh %49 : vector<2x64xf32>
    %51 = arith.mulf %46, %50 : vector<2x64xf32>
    %52 = arith.select %22, %49, %32 : vector<2x64xi1>, vector<2x64xf32>
    %53 = arith.select %22, %51, %27 : vector<2x64xi1>, vector<2x64xf32>
    %54 = vector.extract_strided_slice %12 {offsets = [2, 0], sizes = [2, 256], strides = [1, 1]} : vector<16x256xf32> to vector<2x256xf32>
    %cst_23 = arith.constant dense<0.000000e+00> : vector<2x256xf32>
    %55 = tpu.matmul %53, %13, %cst_23 {dimension_numbers = #tpu.dot_dimension_numbers<[1], [0], [0], [1], [0, 0, 1, 1], [], []>} : vector<2x64xf32>, vector<64x256xf32>, vector<2x256xf32> -> vector<2x256xf32>
    %56 = arith.addf %54, %55 : vector<2x256xf32>
    %57 = math.tanh %56 : vector<2x256xf32>
    %58 = arith.negf %56 : vector<2x256xf32>
    %59 = math.exp %58 : vector<2x256xf32>
    %cst_24 = arith.constant 1.000000e+00 : f32
    %60 = vector.broadcast %cst_24 : f32 to vector<2x256xf32>
    %61 = arith.addf %60, %59 : vector<2x256xf32>
    %62 = arith.divf %60, %61 : vector<2x256xf32>
    %63 = arith.select %19, %57, %62 : vector<2x256xi1>, vector<2x256xf32>
    %64 = vector.extract_strided_slice %63 {offsets = [0, 0], sizes = [2, 64], strides = [1, 1]} : vector<2x256xf32> to vector<2x64xf32>
    %65 = vector.extract_strided_slice %63 {offsets = [0, 64], sizes = [2, 64], strides = [1, 1]} : vector<2x256xf32> to vector<2x64xf32>
    %66 = vector.extract_strided_slice %63 {offsets = [0, 128], sizes = [2, 64], strides = [1, 1]} : vector<2x256xf32> to vector<2x64xf32>
    %67 = vector.extract_strided_slice %63 {offsets = [0, 192], sizes = [2, 64], strides = [1, 1]} : vector<2x256xf32> to vector<2x64xf32>
    %68 = arith.mulf %65, %52 : vector<2x64xf32>
    %69 = arith.mulf %64, %66 : vector<2x64xf32>
    %70 = arith.addf %68, %69 : vector<2x64xf32>
    %71 = math.tanh %70 : vector<2x64xf32>
    %72 = arith.mulf %67, %71 : vector<2x64xf32>
    %73 = vector.extract_strided_slice %12 {offsets = [4, 0], sizes = [2, 256], strides = [1, 1]} : vector<16x256xf32> to vector<2x256xf32>
    %cst_25 = arith.constant dense<0.000000e+00> : vector<2x256xf32>
    %74 = tpu.matmul %72, %13, %cst_25 {dimension_numbers = #tpu.dot_dimension_numbers<[1], [0], [0], [1], [0, 0, 1, 1], [], []>} : vector<2x64xf32>, vector<64x256xf32>, vector<2x256xf32> -> vector<2x256xf32>
    %75 = arith.addf %73, %74 : vector<2x256xf32>
    %76 = math.tanh %75 : vector<2x256xf32>
    %77 = arith.negf %75 : vector<2x256xf32>
    %78 = math.exp %77 : vector<2x256xf32>
    %cst_26 = arith.constant 1.000000e+00 : f32
    %79 = vector.broadcast %cst_26 : f32 to vector<2x256xf32>
    %80 = arith.addf %79, %78 : vector<2x256xf32>
    %81 = arith.divf %79, %80 : vector<2x256xf32>
    %82 = arith.select %19, %76, %81 : vector<2x256xi1>, vector<2x256xf32>
    %83 = vector.extract_strided_slice %82 {offsets = [0, 0], sizes = [2, 64], strides = [1, 1]} : vector<2x256xf32> to vector<2x64xf32>
    %84 = vector.extract_strided_slice %82 {offsets = [0, 64], sizes = [2, 64], strides = [1, 1]} : vector<2x256xf32> to vector<2x64xf32>
    %85 = vector.extract_strided_slice %82 {offsets = [0, 128], sizes = [2, 64], strides = [1, 1]} : vector<2x256xf32> to vector<2x64xf32>
    %86 = vector.extract_strided_slice %82 {offsets = [0, 192], sizes = [2, 64], strides = [1, 1]} : vector<2x256xf32> to vector<2x64xf32>
    %87 = arith.mulf %84, %70 : vector<2x64xf32>
    %88 = arith.mulf %83, %85 : vector<2x64xf32>
    %89 = arith.addf %87, %88 : vector<2x64xf32>
    %90 = math.tanh %89 : vector<2x64xf32>
    %91 = arith.mulf %86, %90 : vector<2x64xf32>
    %92 = vector.extract_strided_slice %12 {offsets = [6, 0], sizes = [2, 256], strides = [1, 1]} : vector<16x256xf32> to vector<2x256xf32>
    %cst_27 = arith.constant dense<0.000000e+00> : vector<2x256xf32>
    %93 = tpu.matmul %91, %13, %cst_27 {dimension_numbers = #tpu.dot_dimension_numbers<[1], [0], [0], [1], [0, 0, 1, 1], [], []>} : vector<2x64xf32>, vector<64x256xf32>, vector<2x256xf32> -> vector<2x256xf32>
    %94 = arith.addf %92, %93 : vector<2x256xf32>
    %95 = math.tanh %94 : vector<2x256xf32>
    %96 = arith.negf %94 : vector<2x256xf32>
    %97 = math.exp %96 : vector<2x256xf32>
    %cst_28 = arith.constant 1.000000e+00 : f32
    %98 = vector.broadcast %cst_28 : f32 to vector<2x256xf32>
    %99 = arith.addf %98, %97 : vector<2x256xf32>
    %100 = arith.divf %98, %99 : vector<2x256xf32>
    %101 = arith.select %19, %95, %100 : vector<2x256xi1>, vector<2x256xf32>
    %102 = vector.extract_strided_slice %101 {offsets = [0, 0], sizes = [2, 64], strides = [1, 1]} : vector<2x256xf32> to vector<2x64xf32>
    %103 = vector.extract_strided_slice %101 {offsets = [0, 64], sizes = [2, 64], strides = [1, 1]} : vector<2x256xf32> to vector<2x64xf32>
    %104 = vector.extract_strided_slice %101 {offsets = [0, 128], sizes = [2, 64], strides = [1, 1]} : vector<2x256xf32> to vector<2x64xf32>
    %105 = vector.extract_strided_slice %101 {offsets = [0, 192], sizes = [2, 64], strides = [1, 1]} : vector<2x256xf32> to vector<2x64xf32>
    %106 = arith.mulf %103, %89 : vector<2x64xf32>
    %107 = arith.mulf %102, %104 : vector<2x64xf32>
    %108 = arith.addf %106, %107 : vector<2x64xf32>
    %109 = math.tanh %108 : vector<2x64xf32>
    %110 = arith.mulf %105, %109 : vector<2x64xf32>
    %111 = vector.extract_strided_slice %12 {offsets = [8, 0], sizes = [2, 256], strides = [1, 1]} : vector<16x256xf32> to vector<2x256xf32>
    %cst_29 = arith.constant dense<0.000000e+00> : vector<2x256xf32>
    %112 = tpu.matmul %110, %13, %cst_29 {dimension_numbers = #tpu.dot_dimension_numbers<[1], [0], [0], [1], [0, 0, 1, 1], [], []>} : vector<2x64xf32>, vector<64x256xf32>, vector<2x256xf32> -> vector<2x256xf32>
    %113 = arith.addf %111, %112 : vector<2x256xf32>
    %114 = math.tanh %113 : vector<2x256xf32>
    %115 = arith.negf %113 : vector<2x256xf32>
    %116 = math.exp %115 : vector<2x256xf32>
    %cst_30 = arith.constant 1.000000e+00 : f32
    %117 = vector.broadcast %cst_30 : f32 to vector<2x256xf32>
    %118 = arith.addf %117, %116 : vector<2x256xf32>
    %119 = arith.divf %117, %118 : vector<2x256xf32>
    %120 = arith.select %19, %114, %119 : vector<2x256xi1>, vector<2x256xf32>
    %121 = vector.extract_strided_slice %120 {offsets = [0, 0], sizes = [2, 64], strides = [1, 1]} : vector<2x256xf32> to vector<2x64xf32>
    %122 = vector.extract_strided_slice %120 {offsets = [0, 64], sizes = [2, 64], strides = [1, 1]} : vector<2x256xf32> to vector<2x64xf32>
    %123 = vector.extract_strided_slice %120 {offsets = [0, 128], sizes = [2, 64], strides = [1, 1]} : vector<2x256xf32> to vector<2x64xf32>
    %124 = vector.extract_strided_slice %120 {offsets = [0, 192], sizes = [2, 64], strides = [1, 1]} : vector<2x256xf32> to vector<2x64xf32>
    %125 = arith.mulf %122, %108 : vector<2x64xf32>
    %126 = arith.mulf %121, %123 : vector<2x64xf32>
    %127 = arith.addf %125, %126 : vector<2x64xf32>
    %128 = math.tanh %127 : vector<2x64xf32>
    %129 = arith.mulf %124, %128 : vector<2x64xf32>
    %130 = vector.extract_strided_slice %12 {offsets = [10, 0], sizes = [2, 256], strides = [1, 1]} : vector<16x256xf32> to vector<2x256xf32>
    %cst_31 = arith.constant dense<0.000000e+00> : vector<2x256xf32>
    %131 = tpu.matmul %129, %13, %cst_31 {dimension_numbers = #tpu.dot_dimension_numbers<[1], [0], [0], [1], [0, 0, 1, 1], [], []>} : vector<2x64xf32>, vector<64x256xf32>, vector<2x256xf32> -> vector<2x256xf32>
    %132 = arith.addf %130, %131 : vector<2x256xf32>
    %133 = math.tanh %132 : vector<2x256xf32>
    %134 = arith.negf %132 : vector<2x256xf32>
    %135 = math.exp %134 : vector<2x256xf32>
    %cst_32 = arith.constant 1.000000e+00 : f32
    %136 = vector.broadcast %cst_32 : f32 to vector<2x256xf32>
    %137 = arith.addf %136, %135 : vector<2x256xf32>
    %138 = arith.divf %136, %137 : vector<2x256xf32>
    %139 = arith.select %19, %133, %138 : vector<2x256xi1>, vector<2x256xf32>
    %140 = vector.extract_strided_slice %139 {offsets = [0, 0], sizes = [2, 64], strides = [1, 1]} : vector<2x256xf32> to vector<2x64xf32>
    %141 = vector.extract_strided_slice %139 {offsets = [0, 64], sizes = [2, 64], strides = [1, 1]} : vector<2x256xf32> to vector<2x64xf32>
    %142 = vector.extract_strided_slice %139 {offsets = [0, 128], sizes = [2, 64], strides = [1, 1]} : vector<2x256xf32> to vector<2x64xf32>
    %143 = vector.extract_strided_slice %139 {offsets = [0, 192], sizes = [2, 64], strides = [1, 1]} : vector<2x256xf32> to vector<2x64xf32>
    %144 = arith.mulf %141, %127 : vector<2x64xf32>
    %145 = arith.mulf %140, %142 : vector<2x64xf32>
    %146 = arith.addf %144, %145 : vector<2x64xf32>
    %147 = math.tanh %146 : vector<2x64xf32>
    %148 = arith.mulf %143, %147 : vector<2x64xf32>
    %149 = vector.extract_strided_slice %12 {offsets = [12, 0], sizes = [2, 256], strides = [1, 1]} : vector<16x256xf32> to vector<2x256xf32>
    %cst_33 = arith.constant dense<0.000000e+00> : vector<2x256xf32>
    %150 = tpu.matmul %148, %13, %cst_33 {dimension_numbers = #tpu.dot_dimension_numbers<[1], [0], [0], [1], [0, 0, 1, 1], [], []>} : vector<2x64xf32>, vector<64x256xf32>, vector<2x256xf32> -> vector<2x256xf32>
    %151 = arith.addf %149, %150 : vector<2x256xf32>
    %152 = math.tanh %151 : vector<2x256xf32>
    %153 = arith.negf %151 : vector<2x256xf32>
    %154 = math.exp %153 : vector<2x256xf32>
    %cst_34 = arith.constant 1.000000e+00 : f32
    %155 = vector.broadcast %cst_34 : f32 to vector<2x256xf32>
    %156 = arith.addf %155, %154 : vector<2x256xf32>
    %157 = arith.divf %155, %156 : vector<2x256xf32>
    %158 = arith.select %19, %152, %157 : vector<2x256xi1>, vector<2x256xf32>
    %159 = vector.extract_strided_slice %158 {offsets = [0, 0], sizes = [2, 64], strides = [1, 1]} : vector<2x256xf32> to vector<2x64xf32>
    %160 = vector.extract_strided_slice %158 {offsets = [0, 64], sizes = [2, 64], strides = [1, 1]} : vector<2x256xf32> to vector<2x64xf32>
    %161 = vector.extract_strided_slice %158 {offsets = [0, 128], sizes = [2, 64], strides = [1, 1]} : vector<2x256xf32> to vector<2x64xf32>
    %162 = vector.extract_strided_slice %158 {offsets = [0, 192], sizes = [2, 64], strides = [1, 1]} : vector<2x256xf32> to vector<2x64xf32>
    %163 = arith.mulf %160, %146 : vector<2x64xf32>
    %164 = arith.mulf %159, %161 : vector<2x64xf32>
    %165 = arith.addf %163, %164 : vector<2x64xf32>
    %166 = math.tanh %165 : vector<2x64xf32>
    %167 = arith.mulf %162, %166 : vector<2x64xf32>
    %168 = vector.extract_strided_slice %12 {offsets = [14, 0], sizes = [2, 256], strides = [1, 1]} : vector<16x256xf32> to vector<2x256xf32>
    %cst_35 = arith.constant dense<0.000000e+00> : vector<2x256xf32>
    %169 = tpu.matmul %167, %13, %cst_35 {dimension_numbers = #tpu.dot_dimension_numbers<[1], [0], [0], [1], [0, 0, 1, 1], [], []>} : vector<2x64xf32>, vector<64x256xf32>, vector<2x256xf32> -> vector<2x256xf32>
    %170 = arith.addf %168, %169 : vector<2x256xf32>
    %171 = math.tanh %170 : vector<2x256xf32>
    %172 = arith.negf %170 : vector<2x256xf32>
    %173 = math.exp %172 : vector<2x256xf32>
    %cst_36 = arith.constant 1.000000e+00 : f32
    %174 = vector.broadcast %cst_36 : f32 to vector<2x256xf32>
    %175 = arith.addf %174, %173 : vector<2x256xf32>
    %176 = arith.divf %174, %175 : vector<2x256xf32>
    %177 = arith.select %19, %171, %176 : vector<2x256xi1>, vector<2x256xf32>
    %178 = vector.extract_strided_slice %177 {offsets = [0, 0], sizes = [2, 64], strides = [1, 1]} : vector<2x256xf32> to vector<2x64xf32>
    %179 = vector.extract_strided_slice %177 {offsets = [0, 64], sizes = [2, 64], strides = [1, 1]} : vector<2x256xf32> to vector<2x64xf32>
    %180 = vector.extract_strided_slice %177 {offsets = [0, 128], sizes = [2, 64], strides = [1, 1]} : vector<2x256xf32> to vector<2x64xf32>
    %181 = vector.extract_strided_slice %177 {offsets = [0, 192], sizes = [2, 64], strides = [1, 1]} : vector<2x256xf32> to vector<2x64xf32>
    %182 = arith.mulf %179, %165 : vector<2x64xf32>
    %183 = arith.mulf %178, %180 : vector<2x64xf32>
    %184 = arith.addf %182, %183 : vector<2x64xf32>
    %185 = math.tanh %184 : vector<2x64xf32>
    %186 = arith.mulf %181, %185 : vector<2x64xf32>
    %187 = vector.extract_strided_slice %12 {offsets = [14, 0], sizes = [2, 256], strides = [1, 1]} : vector<16x256xf32> to vector<2x256xf32>
    %cst_37 = arith.constant dense<0.000000e+00> : vector<2x256xf32>
    %188 = tpu.matmul %186, %13, %cst_37 {dimension_numbers = #tpu.dot_dimension_numbers<[1], [0], [0], [1], [0, 0, 1, 1], [], []>} : vector<2x64xf32>, vector<64x256xf32>, vector<2x256xf32> -> vector<2x256xf32>
    %189 = arith.addf %187, %188 : vector<2x256xf32>
    %190 = math.tanh %189 : vector<2x256xf32>
    %191 = arith.negf %189 : vector<2x256xf32>
    %192 = math.exp %191 : vector<2x256xf32>
    %cst_38 = arith.constant 1.000000e+00 : f32
    %193 = vector.broadcast %cst_38 : f32 to vector<2x256xf32>
    %194 = arith.addf %193, %192 : vector<2x256xf32>
    %195 = arith.divf %193, %194 : vector<2x256xf32>
    %196 = arith.select %19, %190, %195 : vector<2x256xi1>, vector<2x256xf32>
    %197 = vector.extract_strided_slice %196 {offsets = [0, 0], sizes = [2, 64], strides = [1, 1]} : vector<2x256xf32> to vector<2x64xf32>
    %198 = vector.extract_strided_slice %196 {offsets = [0, 64], sizes = [2, 64], strides = [1, 1]} : vector<2x256xf32> to vector<2x64xf32>
    %199 = vector.extract_strided_slice %196 {offsets = [0, 128], sizes = [2, 64], strides = [1, 1]} : vector<2x256xf32> to vector<2x64xf32>
    %200 = vector.extract_strided_slice %196 {offsets = [0, 192], sizes = [2, 64], strides = [1, 1]} : vector<2x256xf32> to vector<2x64xf32>
    %201 = arith.mulf %198, %184 : vector<2x64xf32>
    %202 = arith.mulf %197, %199 : vector<2x64xf32>
    %203 = arith.addf %201, %202 : vector<2x64xf32>
    %204 = math.tanh %203 : vector<2x64xf32>
    %205 = arith.mulf %200, %204 : vector<2x64xf32>
    %206 = arith.select %22, %184, %203 : vector<2x64xi1>, vector<2x64xf32>
    %207 = arith.select %22, %186, %205 : vector<2x64xi1>, vector<2x64xf32>
    %208 = tpu.concatenate %72, %91, %110, %129, %148, %167, %186, %207 in 0 : vector<2x64xf32>, vector<2x64xf32>, vector<2x64xf32>, vector<2x64xf32>, vector<2x64xf32>, vector<2x64xf32>, vector<2x64xf32>, vector<2x64xf32> -> vector<16x64xf32>
    %c0_39 = arith.constant 0 : index
    %c0_40 = arith.constant 0 : index
    %209 = vector.load %arg7[%c0_39, %c0_40] : memref<64x128xf32, #tpu.memory_space<vmem>>, vector<64x128xf32>
    %cst_41 = arith.constant dense<0.000000e+00> : vector<16x128xf32>
    %210 = tpu.matmul %208, %209, %cst_41 {dimension_numbers = #tpu.dot_dimension_numbers<[1], [0], [0], [1], [0, 0, 1, 1], [], []>} : vector<16x64xf32>, vector<64x128xf32>, vector<16x128xf32> -> vector<16x128xf32>
    %c0_42 = arith.constant 0 : index
    %c0_43 = arith.constant 0 : index
    %211 = vector.load %arg8[%c0_42, %c0_43] : memref<1x128xf32, #tpu.memory_space<vmem>>, vector<1x128xf32>
    %212 = vector.broadcast %211 : vector<1x128xf32> to vector<16x128xf32>
    %213 = arith.addf %210, %212 : vector<16x128xf32>
    %c0_44 = arith.constant 0 : index
    %c0_45 = arith.constant 0 : index
    %214 = vector.load %arg9[%c0_44, %c0_45] : memref<16x128xf32, #tpu.memory_space<vmem>>, vector<16x128xf32>
    tpu.vector_store %arg9[%c0_44, %c0_45], %213 {strides = array<i32>} : memref<16x128xf32, #tpu.memory_space<vmem>>, vector<16x128xf32>,
    %215 = vector.extract_strided_slice %207 {offsets = [0, 0], sizes = [2, 32], strides = [1, 1]} : vector<2x64xf32> to vector<2x32xf32>
    %c0_46 = arith.constant 0 : index
    %c0_47 = arith.constant 0 : index
    %c0_48 = arith.constant 0 : index
    %216 = vector.load %arg10[%c0_46, %c0_47, %c0_48] : memref<2x2x32xf32, #tpu.memory_space<vmem>>, vector<1x2x32xf32>
    %217 = vector.shape_cast %216 : vector<1x2x32xf32> to vector<2x32xf32>
    %218 = vector.shape_cast %215 : vector<2x32xf32> to vector<1x2x32xf32>
    tpu.vector_store %arg10[%c0_46, %c0_47, %c0_48], %218 {strides = array<i32>} : memref<2x2x32xf32, #tpu.memory_space<vmem>>, vector<1x2x32xf32>,
    %219 = vector.extract_strided_slice %207 {offsets = [0, 32], sizes = [2, 32], strides = [1, 1]} : vector<2x64xf32> to vector<2x32xf32>
    %c1_49 = arith.constant 1 : index
    %c0_50 = arith.constant 0 : index
    %c0_51 = arith.constant 0 : index
    %220 = vector.load %arg10[%c1_49, %c0_50, %c0_51] : memref<2x2x32xf32, #tpu.memory_space<vmem>>, vector<1x2x32xf32>
    %221 = vector.shape_cast %220 : vector<1x2x32xf32> to vector<2x32xf32>
    %222 = vector.shape_cast %219 : vector<2x32xf32> to vector<1x2x32xf32>
    tpu.vector_store %arg10[%c1_49, %c0_50, %c0_51], %222 {strides = array<i32>} : memref<2x2x32xf32, #tpu.memory_space<vmem>>, vector<1x2x32xf32>,
    %223 = vector.extract_strided_slice %206 {offsets = [0, 0], sizes = [2, 32], strides = [1, 1]} : vector<2x64xf32> to vector<2x32xf32>
    %c0_52 = arith.constant 0 : index
    %c0_53 = arith.constant 0 : index
    %c0_54 = arith.constant 0 : index
    %224 = vector.load %arg11[%c0_52, %c0_53, %c0_54] : memref<2x2x32xf32, #tpu.memory_space<vmem>>, vector<1x2x32xf32>
    %225 = vector.shape_cast %224 : vector<1x2x32xf32> to vector<2x32xf32>
    %226 = vector.shape_cast %223 : vector<2x32xf32> to vector<1x2x32xf32>
    tpu.vector_store %arg11[%c0_52, %c0_53, %c0_54], %226 {strides = array<i32>} : memref<2x2x32xf32, #tpu.memory_space<vmem>>, vector<1x2x32xf32>,
    %227 = vector.extract_strided_slice %206 {offsets = [0, 32], sizes = [2, 32], strides = [1, 1]} : vector<2x64xf32> to vector<2x32xf32>
    %c1_55 = arith.constant 1 : index
    %c0_56 = arith.constant 0 : index
    %c0_57 = arith.constant 0 : index
    %228 = vector.load %arg11[%c1_55, %c0_56, %c0_57] : memref<2x2x32xf32, #tpu.memory_space<vmem>>, vector<1x2x32xf32>
    %229 = vector.shape_cast %228 : vector<1x2x32xf32> to vector<2x32xf32>
    %230 = vector.shape_cast %227 : vector<2x32xf32> to vector<1x2x32xf32>
    tpu.vector_store %arg11[%c1_55, %c0_56, %c0_57], %230 {strides = array<i32>} : memref<2x2x32xf32, #tpu.memory_space<vmem>>, vector<1x2x32xf32>,
    return
  }
}

</mosaic_0001>

<bundles_post_ra>
// kernel: name_generator_forward.1
= control target key start
LH: loop header
LB: loop body
LE: loop exit
PB: predicated region body
PF: predicated region fallthrough
CT: control target
= control target key end

     0   :  { %17 = vsyncpa [#allocation3], 0  ;;  %v1517_v2 = vmov 0   ;;  %s2089_s0 = inlined_call_operand.vmem [shape: s32[16,1], index: 0, kind: input, shape index: {}]   ;;  %s2090_s1 = inlined_call_operand.vmem [shape: f32[32,16], index: 1, kind: input, shape index: {}]   ;;  %s2091_s2 = inlined_call_operand.vmem [shape: f32[16,256], index: 2, kind: input, shape index: {}]   ;;  %s2092_s3 = inlined_call_operand.vmem [shape: f32[64,256], index: 3, kind: input, shape index: {}]   ;;  %s2093_s4 = inlined_call_operand.vmem [shape: f32[1,256], index: 4, kind: input, shape index: {}]   ;;  %s2094_s5 = inlined_call_operand.vmem [shape: f32[2,2,32], index: 5, kind: input, shape index: {}, may-alias: {5,6}]   ;;  %s2095_s6 = inlined_call_operand.vmem [shape: f32[2,2,32], index: 6, kind: input, shape index: {}, may-alias: {5,6}]   ;;  %s2096_s7 = inlined_call_operand.vmem [shape: f32[64,128], index: 7, kind: input, shape index: {}]   ;;  %s2097_s8 = inlined_call_operand.vmem [shape: f32[1,128], index: 8, kind: input, shape index: {}]   ;;  %s2098_s9 = inlined_call_operand.vmem [shape: f32[16,128], index: 9, kind: output, shape index: {0}]   ;;  %s2099_s10 = inlined_call_operand.hbm [shape: f32[2,2,32], index: 10, kind: output, shape index: {1}]   ;;  %s2100_s11 = inlined_call_operand.hbm [shape: f32[2,2,32], index: 11, kind: output, shape index: {2}]  }
   0x1   :  { %v37_v0 = vld [vmem:[%s2089_s0] sm:$0xff]  ;;  %v56_v1 = vld [vmem:[%s2090_s1 + $0x18] sm:$0xff]  ;;  %1355 = vset.pattern.permute.xlu0 %v1517_v2  ;;  %v55_v3 = vld [vmem:[%s2090_s1 + $0x10] sm:$0xff] }
   0x2   :  { %76 = vmatpush.msra.mxu0 %v56_v1  ;;  %42 = vperm.xlu0 %1355, %v37_v0   ;;  %v54_v4 = vld [vmem:[%s2090_s1 + $0x8] sm:$0xff] }
   0x3   :  { %18 = vsyncpa [#allocation5], 0  ;;  %v38_v5 = vld [vmem:[%s2089_s0 + $0x8] sm:$0xff]  ;;  %v53_v6 = vld [vmem:[%s2090_s1] sm:$0xff]  ;;  %s1518_s14 = smov 32   ;;  %v39_v11 = vlaneseq  ;;  %vm57_vm0 = vcmask 261120  }
   0x4   :  { %77 = vmatpush.msra.mxu0 %v55_v3  ;;  %v1307_v7 = vld [vmem:[%s2094_s5 + $0x2] sm:$0x3]  ;;  %v89_v8 = vld [vmem:[%s2091_s2 + $0x10] sm:$0xff]  ;;  %v90_v9 = vld [vmem:[%s2091_s2 + $0x18] sm:$0xff]  ;;  %v1519_v14 = vmov 0.0   ;;  %s1520_s13 = smov 64  }
   0x5   :  { %178 = vrot.lane.b32.xlu1 %v1307_v7, %s1518_s14  ;;  %118 = vmatpush.msra.mxu1 %v89_v8  ;;  %v1308_v10 = vld [vmem:[%s2095_s6 + $0x2] sm:$0x3]  ;;  %v1617_v12 = vand.u32 127, %v39_v11  ;;  %v88_v19 = vld [vmem:[%s2091_s2 + $0x8] sm:$0xff]  ;;  %v1632_v20 = vld [vmem:[%s2092_s3 + $0x70] sm:$0xff]  ;;  %vm97_vm3 = vcmask 130048  }
   0x6   :  { %78 = vmatpush.msra.mxu0 %v54_v4  ;;  %141 = vmatpush.msra.mxu3 %v90_v9  ;;  %v87_v18 = vld [vmem:[%s2091_s2] sm:$0xff]  ;;  %v1637_v21 = vld [vmem:[%s2092_s3 + $0x78] sm:$0xff]  ;;  %v1649_v23 = vld [vmem:[%s2092_s3 + $0x68] sm:$0xff]  ;;  %vm190_vm4 = vcmask 523264   ;;  %s1267_s0 = sshll.u32 %s2099_s10, 4  ;;  %s1280_s17 = sshll.u32 %s2100_s11, 4  ;;  %s1268_s0 = int_to_ptr.hbm [resolvable:$true] %s1267_s0  ;;  %s1281_s17 = int_to_ptr.hbm [resolvable:$true] %s1280_s17 }
   0x7   :  { %119 = vmatpush.msra.mxu1 %v87_v18  ;;  %v1642_v22 = vld [vmem:[%s2092_s3 + $0x60] sm:$0xff]  ;;  %v1654_v24 = vld [vmem:[%s2092_s3 + $0x50] sm:$0xff]  ;;  %v1659_v25 = vld [vmem:[%s2092_s3 + $0x58] sm:$0xff]  ;;  %312 = vmatpush.msra.mxu2 %v1632_v20  ;;  %vm173_vm14 = vcmp.lt.s32.totalorder %v1617_v12, 32  ;;  %s1524_s18 = smov 2  }
   0x8   :  { %79 = vmatpush.msra.mxu0 %v53_v6  ;;  %142 = vmatpush.msra.mxu3 %v88_v19  ;;  %v1668_v26 = vld [vmem:[%s2092_s3 + $0x40] sm:$0xff]  ;;  %v1677_v27 = vld [vmem:[%s2092_s3 + $0x48] sm:$0xff]  ;;  %v1686_v28 = vld [vmem:[%s2092_s3 + $0x30] sm:$0xff] }
   0x9   :  { %222 = vmatpush.msrb.mxu1 %v1637_v21  ;;  %313 = vmatpush.msra.mxu2 %v1642_v22  ;;  %v1691_v29 = vld [vmem:[%s2092_s3 + $0x38] sm:$0xff]  ;;  %v1696_v30 = vld [vmem:[%s2092_s3 + $0x20] sm:$0xff]  ;;  %v1707_v32 = vld [vmem:[%s2092_s3 + $0x28] sm:$0xff] }
   0xa   :  { %45 = vperm.xlu0 %1355, %v38_v5   ;;  %202 = vmatpush.msrb.mxu3 %v1632_v20  ;;  %v1712_v33 = vld [vmem:[%s2092_s3 + $0x10] sm:$0xff]  ;;  %v1717_v34 = vld [vmem:[%s2092_s3 + $0x18] sm:$0xff]  ;;  %v1726_v35 = vld [vmem:[%s2092_s3] sm:$0xff] }
   0xb   :  { %332 = vmatpush.msrb.mxu0 %v1637_v21  ;;  %223 = vmatpush.msrb.mxu1 %v1649_v23  ;;  %v1731_v36 = vld [vmem:[%s2092_s3 + $0x8] sm:$0xff]  ;;  %v182_v38 = vld [vmem:[%s2095_s6] sm:$0x3]  ;;  %s1522_s3 = smov [#allocation2]  }
   0xc   :  { %203 = vmatpush.msrb.mxu3 %v1642_v22  ;;  %314 = vmatpush.msra.mxu2 %v1654_v24  ;;  %v174_v42 = vld [vmem:[%s2094_s5] sm:$0x3]  ;;  %s1265_s6 = sshll.u32 %s1522_s3, 4  ;;  %s1266_s6 = int_to_ptr.vmem [resolvable:$true] %s1265_s6 }
   0xd   :  { %186 = vrot.lane.b32.xlu1 %v1308_v10, %s1518_s14  ;;  %333 = vmatpush.msrb.mxu0 %v1649_v23  ;;  %v91_v45 = vld [vmem:[%s2093_s4] sm:$0x3]  ;;  %v1828_v10 = vadd.s32 128, %v1617_v12 }
   0xe   :  { %204 = vmatpush.msrb.mxu3 %v1654_v24  ;;  %224 = vmatpush.msrb.mxu1 %v1659_v25  ;;  %v93_v47 = vperm.slane %v91_v45, 0  ;;  %v94_v50 = vperm.slane %v91_v45, 1 }
   0xf   :  { %334 = vmatpush.msrb.mxu0 %v1659_v25  ;;  %315 = vmatpush.msra.mxu2 %v1668_v26  ;;  %vm170_vm10 = vcmp.lt.s32.totalorder %v1828_v10, 192  ;;  %v1199_v10 = vld [vmem:[%s2096_s7 + $0x8] sm:$0xff] }
  0x10   :  { %205 = vmatpush.msrb.mxu3 %v1668_v26  ;;  %225 = vmatpush.msrb.mxu1 %v1677_v27 }
  0x11   :  { %335 = vmatpush.msrb.mxu0 %v1677_v27  ;;  %316 = vmatpush.msra.mxu2 %v1686_v28 }
  0x12   :  { %206 = vmatpush.msrb.mxu3 %v1686_v28  ;;  %226 = vmatpush.msrb.mxu1 %v1691_v29 }
  0x13   :  { %336 = vmatpush.msrb.mxu0 %v1691_v29  ;;  %317 = vmatpush.msra.mxu2 %v1696_v30 }
  0x14   :  { %207 = vmatpush.msrb.mxu3 %v1696_v30  ;;  %227 = vmatpush.msrb.mxu1 %v1707_v32 }
  0x15   :  { %337 = vmatpush.msrb.mxu0 %v1707_v32  ;;  %318 = vmatpush.msra.mxu2 %v1712_v33 }
  0x16   :  { %208 = vmatpush.msrb.mxu3 %v1712_v33  ;;  %228 = vmatpush.msrb.mxu1 %v1717_v34 }
  0x17   :  { %338 = vmatpush.msrb.mxu0 %v1717_v34  ;;  %319 = vmatpush.msra.mxu2 %v1726_v35 }
  0x18   :  { %209 = vmatpush.msrb.mxu3 %v1726_v35  ;;  %229 = vmatpush.msrb.mxu1 %v1731_v36 }
  0x19   :  { %339 = vmatpush.msrb.mxu0 %v1731_v36  ;;  %530 = vmatpush.msrb.mxu2 %v1632_v20 }
  0x1b   :  { %531 = vmatpush.msrb.mxu2 %v1642_v22 }
  0x1d   :  { %532 = vmatpush.msrb.mxu2 %v1654_v24 }
  0x1f   :  { %533 = vmatpush.msrb.mxu2 %v1668_v26 }
  0x21   :  { %534 = vmatpush.msrb.mxu2 %v1686_v28 }
  0x23   :  { %535 = vmatpush.msrb.mxu2 %v1696_v30 }
  0x25   :  { %536 = vmatpush.msrb.mxu2 %v1712_v33 }
  0x27   :  { %537 = vmatpush.msrb.mxu2 %v1726_v35 }
  0x74   :  { %v43_v13 = vpop.permute.xlu0 %42 }
  0x75   :  { %vm47_vm1 = vcmp.eq.s32.totalorder %v43_v13, %v1617_v12 }
  0x76   :  { %v1299_v15 = vsel %vm47_vm1, 1.0, %v1519_v14 }
  0x77   :  { %1301 = vmatmul.msk.f32.vlgmr.msra.gmra.mxu0 %vm57_vm0, %v1299_v15  ;;  %v1698_v31 = vpop.permute.xlu1 %178 }
  0x78   :  { %550 = vmatpush.msra.mxu0 %v1637_v21  ;;  %v1788_v43 = vsel %vm57_vm0, %v174_v42, %v1698_v31 }
  0x7a   :  { %551 = vmatpush.msra.mxu0 %v1649_v23 }
  0x7c   :  { %v46_v16 = vpop.permute.xlu0 %45  ;;  %552 = vmatpush.msra.mxu0 %v1659_v25 }
  0x7d   :  { %vm48_vm2 = vcmp.eq.s32.totalorder %v46_v16, %v1617_v12 }
  0x7e   :  { %v1300_v17 = vsel %vm48_vm2, 1.0, %v1519_v14  ;;  %553 = vmatpush.msra.mxu0 %v1677_v27 }
  0x7f   :  { %1302 = vmatmul.msk.f32.gmra.mxu0 %vm57_vm0, %v1300_v17  ;;  %v187_v37 = vpop.permute.xlu1 %186 }
  0x80   :  { %v1747_v39 = vsel %vm57_vm0, %v182_v38, %v187_v37  ;;  %554 = vmatpush.msra.mxu0 %v1691_v29 }
  0x81   :  { %279 = vrot.lane.b32.xlu2 %v1747_v39, %s1520_s13 }
  0x82   :  { %555 = vmatpush.msra.mxu0 %v1707_v32 }
  0x84   :  { %556 = vmatpush.msra.mxu0 %v1717_v34 }
  0x86   :  { %557 = vmatpush.msra.mxu0 %v1731_v36 }
  0xf4   :  { %v81_v40 = vpop.f32.mrf.mxu0 }
  0xf5   :  { %1303 = vmatmul.msk.f32.vlgmr.msra.gmra.mxu1 %vm97_vm3, %v81_v40  ;;  %1305 = vmatmul.msk.f32.vlgmr.msra.gmra.mxu3 %vm97_vm3, %v81_v40 }
  0xf6   :  { %422 = vmatpush.msra.mxu3 %v1632_v20  ;;  %442 = vmatpush.msra.mxu1 %v1637_v21 }
  0xf8   :  { %423 = vmatpush.msra.mxu3 %v1642_v22  ;;  %443 = vmatpush.msra.mxu1 %v1649_v23 }
  0xfa   :  { %424 = vmatpush.msra.mxu3 %v1654_v24  ;;  %444 = vmatpush.msra.mxu1 %v1659_v25 }
  0xfc   :  { %v84_v41 = vpop.f32.mrf.mxu0  ;;  %425 = vmatpush.msra.mxu3 %v1668_v26  ;;  %445 = vmatpush.msra.mxu1 %v1677_v27 }
  0xfd   :  { %1304 = vmatmul.msk.f32.gmra.mxu1 %vm97_vm3, %v84_v41  ;;  %1306 = vmatmul.msk.f32.gmra.mxu3 %vm97_vm3, %v84_v41 }
  0xfe   :  { %426 = vmatpush.msra.mxu3 %v1686_v28  ;;  %446 = vmatpush.msra.mxu1 %v1691_v29 }
 0x100   :  { %427 = vmatpush.msra.mxu3 %v1696_v30  ;;  %447 = vmatpush.msra.mxu1 %v1707_v32 }
 0x102   :  { %428 = vmatpush.msra.mxu3 %v1712_v33  ;;  %448 = vmatpush.msra.mxu1 %v1717_v34 }
 0x104   :  { %429 = vmatpush.msra.mxu3 %v1726_v35  ;;  %449 = vmatpush.msra.mxu1 %v1731_v36 }
 0x105   :  { %1309 = vmatmul.msk.f32.vlgmr.msrb.gmra.mxu3 %vm190_vm4, %v1788_v43  ;;  %1310 = vmatmul.msk.f32.vlgmr.msrb.gmra.mxu1 %vm190_vm4, %v1788_v43 }
 0x106   :  { %638 = vmatpush.msrb.mxu3 %v1632_v20  ;;  %658 = vmatpush.msrb.mxu1 %v1637_v21 }
 0x108   :  { %639 = vmatpush.msrb.mxu3 %v1642_v22  ;;  %659 = vmatpush.msrb.mxu1 %v1649_v23 }
 0x10a   :  { %640 = vmatpush.msrb.mxu3 %v1654_v24  ;;  %660 = vmatpush.msrb.mxu1 %v1659_v25 }
 0x10c   :  { %641 = vmatpush.msrb.mxu3 %v1668_v26  ;;  %661 = vmatpush.msrb.mxu1 %v1677_v27 }
 0x10e   :  { %642 = vmatpush.msrb.mxu3 %v1686_v28  ;;  %662 = vmatpush.msrb.mxu1 %v1691_v29 }
 0x110   :  { %643 = vmatpush.msrb.mxu3 %v1696_v30  ;;  %663 = vmatpush.msrb.mxu1 %v1707_v32 }
 0x112   :  { %644 = vmatpush.msrb.mxu3 %v1712_v33  ;;  %664 = vmatpush.msrb.mxu1 %v1717_v34 }
 0x114   :  { %645 = vmatpush.msrb.mxu3 %v1726_v35  ;;  %665 = vmatpush.msrb.mxu1 %v1731_v36 }
 0x172   :  { %v121_v44 = vpop.f32.mrf.mxu1 }
 0x173   :  { %v1824_v57 = vadd.f32 %v121_v44, %v93_v47  ;;  %v280_v44 = vpop.permute.xlu2 %279 }
 0x178   :  { %v144_v46 = vpop.f32.mrf.mxu3 }
 0x179   :  { %v1819_v52 = vadd.f32 %v144_v46, %v94_v50 }
 0x17a   :  { %v124_v48 = vpop.f32.mrf.mxu1 }
 0x17b   :  { %v1817_v49 = vadd.f32 %v124_v48, %v93_v47 }
 0x180   :  { %v147_v51 = vpop.f32.mrf.mxu3 }
 0x181   :  { %v1821_v53 = vadd.f32 %v147_v51, %v94_v50 }
 0x182   :  { %v231_v54 = vpop.f32.mrf.mxu1 }
 0x183   :  { %v235_v55 = vadd.f32 %v231_v54, %v1819_v52 }
 0x185   :  { %v1312_v56 = vmul.f32 -1.442695, %v235_v55 }
 0x187   :  { %1357 = vpow2.f32 %v1312_v56 }
 0x188   :  { %v211_v58 = vpop.f32.mrf.mxu3 }
 0x189   :  { %v234_v59 = vadd.f32 %v211_v58, %v1824_v57 }
 0x18b   :  { %v1311_v60 = vmul.f32 -1.442695, %v234_v59 }
 0x18d   :  { %v1358_v61 = vpop.eup %1357  ;;  %1359 = vpow2.f32 %v1311_v60 }
 0x18e   :  { %v245_v62 = vadd.f32 1.0, %v1358_v61 }
 0x190   :  { %1361 = vrcp.f32 %v245_v62  ;;  %v272_v8 = vand.u32 2147483648, %v245_v62  ;;  %vm266_vm6 = vweird.f32 %v245_v62  ;;  %v270_v9 = vand.u32 2147483647, %v245_v62 }
 0x192   :  { %v273_v17 = vor.u32 1.1754944e-38, %v272_v8  ;;  %vm271_vm9 = vcmp.eq.f32.partialorder %v270_v9, 8.507059e+37 }
 0x193   :  { %v1360_v63 = vpop.eup %1359 }
 0x194   :  { %v244_v0 = vadd.f32 1.0, %v1360_v63 }
 0x196   :  { %v1362_v1 = vpop.eup %1361  ;;  %1363 = vrcp.f32 %v244_v0  ;;  %v257_v13 = vand.u32 2147483648, %v244_v0  ;;  %v255_v16 = vand.u32 2147483647, %v244_v0  ;;  %vm251_vm11 = vweird.f32 %v244_v0 }
 0x197   :  { %v262_v2 = vmul.f32 %v1362_v1, %v245_v62  ;;  %vm267_vm5 = vweird.f32 %v1362_v1  ;;  %1365 = vtanh.f32 %v235_v55 }
 0x198   :  { %vm268_vm7 = vmor %vm266_vm6, %vm267_vm5  ;;  %v258_v31 = vor.u32 1.1754944e-38, %v257_v13  ;;  %vm256_vm13 = vcmp.eq.f32.partialorder %v255_v16, 8.507059e+37 }
 0x199   :  { %v263_v3 = vsub.f32 1.0, %v262_v2 }
 0x19b   :  { %v264_v4 = vmul.f32 %v1362_v1, %v263_v3 }
 0x19c   :  { %v1364_v5 = vpop.eup %1363 }
 0x19d   :  { %v247_v6 = vmul.f32 %v1364_v5, %v244_v0  ;;  %v265_v7 = vadd.f32 %v1362_v1, %v264_v4  ;;  %vm252_vm8 = vweird.f32 %v1364_v5  ;;  %v1366_v37 = vpop.eup %1365 }
 0x19e   :  { %vm253_vm12 = vmor %vm251_vm11, %vm252_vm8 }
 0x19f   :  { %v248_v11 = vsub.f32 1.0, %v247_v6  ;;  %v269_v14 = vsel %vm268_vm7, %v1362_v1, %v265_v7 }
 0x1a0   :  { %v274_v19 = vsel %vm271_vm9, %v273_v17, %v269_v14 }
 0x1a1   :  { %v249_v15 = vmul.f32 %v1364_v5, %v248_v11  ;;  %v277_v41 = vsel %vm170_vm10, %v1366_v37, %v274_v19 }
 0x1a3   :  { %v250_v18 = vadd.f32 %v1364_v5, %v249_v15 }
 0x1a5   :  { %v254_v38 = vsel %vm253_vm12, %v1364_v5, %v250_v18 }
 0x1a6   :  { %v259_v40 = vsel %vm256_vm13, %v258_v31, %v254_v38 }
 0x1a7   :  { %v283_v42 = vmul.f32 %v277_v41, %v259_v40  ;;  %v282_v45 = vmul.f32 %v280_v44, %v259_v40 }
 0x1a9   :  { %285 = vrot.lane.b32.xlu2 %v283_v42, %s1520_s13 }
 0x203   :  { %v286_v46 = vpop.permute.xlu2 %285 }
 0x204   :  { %v288_v47 = vadd.f32 %v286_v46, %v282_v45 }
 0x206   :  { %1367 = vtanh.f32 %v288_v47  ;;  %292 = vrot.lane.b32.xlu1 %v288_v47, %s1520_s13 }
 0x20c   :  { %v1368_v48 = vpop.eup %1367 }
 0x20d   :  { %v290_v50 = vmul.f32 %v1368_v48, %v277_v41 }
 0x20f   :  { %297 = vrot.lane.b32.xlu0 %v290_v50, %s1520_s13 }
 0x278   :  { %v293_v51 = vpop.permute.xlu1 %292 }
 0x279   :  { %v295_v54 = vsel %vm173_vm14, %v293_v51, %v1747_v39 }
 0x27a   :  { %v395_v55 = vrot.slane %v295_v54, 6 }
 0x27c   :  { %396 = vrot.lane.b32.xlu2 %v395_v55, %s1520_s13 }
 0x281   :  { %v298_v56 = vpop.permute.xlu0 %297 }
 0x282   :  { %v300_v58 = vsel %vm173_vm14, %v298_v56, %v1788_v43 }
 0x283   :  { %1313 = vmatmul.msk.f32.vlgmr.msra.gmra.mxu2 %vm190_vm4, %v300_v58  ;;  %1314 = vmatmul.msk.f32.vlgmr.msrb.gmra.mxu0 %vm190_vm4, %v300_v58 }
 0x284   :  { %739 = vmatpush.msra.mxu2 %v1632_v20  ;;  %759 = vmatpush.msrb.mxu0 %v1637_v21 }
 0x286   :  { %740 = vmatpush.msra.mxu2 %v1642_v22  ;;  %760 = vmatpush.msrb.mxu0 %v1649_v23 }
 0x288   :  { %741 = vmatpush.msra.mxu2 %v1654_v24  ;;  %761 = vmatpush.msrb.mxu0 %v1659_v25 }
 0x28a   :  { %742 = vmatpush.msra.mxu2 %v1668_v26  ;;  %762 = vmatpush.msrb.mxu0 %v1677_v27 }
 0x28c   :  { %743 = vmatpush.msra.mxu2 %v1686_v28  ;;  %763 = vmatpush.msrb.mxu0 %v1691_v29 }
 0x28e   :  { %744 = vmatpush.msra.mxu2 %v1696_v30  ;;  %764 = vmatpush.msrb.mxu0 %v1707_v32 }
 0x290   :  { %745 = vmatpush.msra.mxu2 %v1712_v33  ;;  %765 = vmatpush.msrb.mxu0 %v1717_v34 }
 0x292   :  { %746 = vmatpush.msra.mxu2 %v1726_v35  ;;  %766 = vmatpush.msrb.mxu0 %v1731_v36 }
 0x2d6   :  { %v397_v48 = vpop.permute.xlu2 %396 }
 0x300   :  { %v341_v39 = vpop.f32.mrf.mxu0 }
 0x301   :  { %v347_v43 = vrot.slane %v341_v39, 6 }
 0x303   :  { %v351_v59 = vadd.f32 %v347_v43, %v1819_v52 }
 0x305   :  { %v1316_v60 = vmul.f32 -1.442695, %v351_v59 }
 0x306   :  { %v321_v61 = vpop.f32.mrf.mxu2 }
 0x307   :  { %1369 = vpow2.f32 %v1316_v60  ;;  %v346_v62 = vrot.slane %v321_v61, 6 }
 0x309   :  { %v350_v63 = vadd.f32 %v346_v62, %v1824_v57 }
 0x30b   :  { %v1315_v0 = vmul.f32 -1.442695, %v350_v63 }
 0x30d   :  { %v1370_v1 = vpop.eup %1369  ;;  %1371 = vpow2.f32 %v1315_v0 }
 0x30e   :  { %v361_v2 = vadd.f32 1.0, %v1370_v1 }
 0x310   :  { %1373 = vrcp.f32 %v361_v2  ;;  %v388_v14 = vand.u32 2147483648, %v361_v2  ;;  %vm382_vm0 = vweird.f32 %v361_v2  ;;  %v386_v15 = vand.u32 2147483647, %v361_v2 }
 0x312   :  { %v389_v37 = vor.u32 1.1754944e-38, %v388_v14  ;;  %vm387_vm3 = vcmp.eq.f32.partialorder %v386_v15, 8.507059e+37 }
 0x313   :  { %v1372_v3 = vpop.eup %1371 }
 0x314   :  { %v360_v4 = vadd.f32 1.0, %v1372_v3 }
 0x316   :  { %v1374_v5 = vpop.eup %1373  ;;  %1375 = vrcp.f32 %v360_v4  ;;  %v373_v17 = vand.u32 2147483648, %v360_v4  ;;  %v371_v31 = vand.u32 2147483647, %v360_v4  ;;  %vm367_vm5 = vweird.f32 %v360_v4 }
 0x317   :  { %v378_v6 = vmul.f32 %v1374_v5, %v361_v2  ;;  %vm383_vm15 = vweird.f32 %v1374_v5  ;;  %1377 = vtanh.f32 %v351_v59 }
 0x318   :  { %vm384_vm1 = vmor %vm382_vm0, %vm383_vm15  ;;  %v374_v41 = vor.u32 1.1754944e-38, %v373_v17  ;;  %vm372_vm7 = vcmp.eq.f32.partialorder %v371_v31, 8.507059e+37 }
 0x319   :  { %v379_v7 = vsub.f32 1.0, %v378_v6 }
 0x31b   :  { %v380_v8 = vmul.f32 %v1374_v5, %v379_v7 }
 0x31c   :  { %v1376_v9 = vpop.eup %1375 }
 0x31d   :  { %v363_v11 = vmul.f32 %v1376_v9, %v360_v4  ;;  %v381_v13 = vadd.f32 %v1374_v5, %v380_v8  ;;  %vm368_vm2 = vweird.f32 %v1376_v9  ;;  %v1378_v42 = vpop.eup %1377 }
 0x31e   :  { %vm369_vm6 = vmor %vm367_vm5, %vm368_vm2 }
 0x31f   :  { %v364_v16 = vsub.f32 1.0, %v363_v11  ;;  %v385_v18 = vsel %vm384_vm1, %v1374_v5, %v381_v13 }
 0x320   :  { %v390_v40 = vsel %vm387_vm3, %v389_v37, %v385_v18 }
 0x321   :  { %v365_v19 = vmul.f32 %v1376_v9, %v364_v16  ;;  %v393_v46 = vsel %vm170_vm10, %v1378_v42, %v390_v40 }
 0x323   :  { %v366_v38 = vadd.f32 %v1376_v9, %v365_v19 }
 0x325   :  { %v370_v44 = vsel %vm369_vm6, %v1376_v9, %v366_v38 }
 0x326   :  { %v375_v45 = vsel %vm372_vm7, %v374_v41, %v370_v44 }
 0x327   :  { %v400_v47 = vmul.f32 %v393_v46, %v375_v45  ;;  %v399_v50 = vmul.f32 %v397_v48, %v375_v45 }
 0x329   :  { %402 = vrot.lane.b32.xlu0 %v400_v47, %s1520_s13 }
 0x39b   :  { %v403_v51 = vpop.permute.xlu0 %402 }
 0x39c   :  { %v1867_v54 = vadd.f32 %v403_v51, %v399_v50 }
 0x39e   :  { %1379 = vtanh.f32 %v1867_v54  ;;  %v505_v45 = vrot.slane %v1867_v54, 6 }
 0x3a4   :  { %v1380_v55 = vpop.eup %1379 }
 0x3a5   :  { %v1870_v56 = vmul.f32 %v1380_v55, %v393_v46 }
 0x3a7   :  { %v409_v58 = vrot.slane %v1870_v56, 2 }
 0x3a9   :  { %410 = vrot.lane.b32.xlu1 %v409_v58, %s1520_s13 }
 0x41b   :  { %v411_v39 = vpop.permute.xlu1 %410 }
 0x41c   :  { %1317 = vmatmul.msk.f32.vlgmr.msra.gmra.mxu3 %vm190_vm4, %v411_v39  ;;  %1318 = vmatmul.msk.f32.vlgmr.msra.gmra.mxu1 %vm190_vm4, %v411_v39 }
 0x41d   :  { %847 = vmatpush.msra.mxu3 %v1632_v20  ;;  %867 = vmatpush.msra.mxu1 %v1637_v21 }
 0x41f   :  { %848 = vmatpush.msra.mxu3 %v1642_v22  ;;  %868 = vmatpush.msra.mxu1 %v1649_v23 }
 0x421   :  { %849 = vmatpush.msra.mxu3 %v1654_v24  ;;  %869 = vmatpush.msra.mxu1 %v1659_v25 }
 0x423   :  { %850 = vmatpush.msra.mxu3 %v1668_v26  ;;  %870 = vmatpush.msra.mxu1 %v1677_v27 }
 0x425   :  { %851 = vmatpush.msra.mxu3 %v1686_v28  ;;  %871 = vmatpush.msra.mxu1 %v1691_v29 }
 0x427   :  { %852 = vmatpush.msra.mxu3 %v1696_v30  ;;  %872 = vmatpush.msra.mxu1 %v1707_v32 }
 0x429   :  { %853 = vmatpush.msra.mxu3 %v1712_v33  ;;  %873 = vmatpush.msra.mxu1 %v1717_v34 }
 0x42b   :  { %854 = vmatpush.msra.mxu3 %v1726_v35  ;;  %874 = vmatpush.msra.mxu1 %v1731_v36 }
 0x499   :  { %v451_v43 = vpop.f32.mrf.mxu1 }
 0x49a   :  { %v457_v59 = vrot.slane %v451_v43, 4 }
 0x49c   :  { %v461_v60 = vadd.f32 %v457_v59, %v1819_v52 }
 0x49e   :  { %v1320_v61 = vmul.f32 -1.442695, %v461_v60 }
 0x49f   :  { %v431_v62 = vpop.f32.mrf.mxu3 }
 0x4a0   :  { %1381 = vpow2.f32 %v1320_v61  ;;  %v456_v63 = vrot.slane %v431_v62, 4 }
 0x4a2   :  { %v460_v0 = vadd.f32 %v456_v63, %v1824_v57 }
 0x4a4   :  { %v1319_v1 = vmul.f32 -1.442695, %v460_v0 }
 0x4a6   :  { %v1382_v2 = vpop.eup %1381  ;;  %1383 = vpow2.f32 %v1319_v1 }
 0x4a7   :  { %v471_v3 = vadd.f32 1.0, %v1382_v2 }
 0x4a9   :  { %1385 = vrcp.f32 %v471_v3  ;;  %v498_v15 = vand.u32 2147483648, %v471_v3  ;;  %vm492_vm9 = vweird.f32 %v471_v3  ;;  %v496_v16 = vand.u32 2147483647, %v471_v3 }
 0x4ab   :  { %v499_v38 = vor.u32 1.1754944e-38, %v498_v15  ;;  %vm497_vm13 = vcmp.eq.f32.partialorder %v496_v16, 8.507059e+37 }
 0x4ac   :  { %v1384_v4 = vpop.eup %1383 }
 0x4ad   :  { %v470_v5 = vadd.f32 1.0, %v1384_v4 }
 0x4af   :  { %v1386_v6 = vpop.eup %1385  ;;  %1387 = vrcp.f32 %v470_v5  ;;  %v483_v18 = vand.u32 2147483648, %v470_v5  ;;  %v481_v37 = vand.u32 2147483647, %v470_v5  ;;  %vm477_vm15 = vweird.f32 %v470_v5 }
 0x4b0   :  { %v488_v7 = vmul.f32 %v1386_v6, %v471_v3  ;;  %vm493_vm8 = vweird.f32 %v1386_v6  ;;  %1389 = vtanh.f32 %v461_v60 }
 0x4b1   :  { %vm494_vm11 = vmor %vm492_vm9, %vm493_vm8  ;;  %v484_v42 = vor.u32 1.1754944e-38, %v483_v18  ;;  %vm482_vm1 = vcmp.eq.f32.partialorder %v481_v37, 8.507059e+37 }
 0x4b2   :  { %v489_v8 = vsub.f32 1.0, %v488_v7 }
 0x4b4   :  { %v490_v9 = vmul.f32 %v1386_v6, %v489_v8 }
 0x4b5   :  { %v1388_v11 = vpop.eup %1387 }
 0x4b6   :  { %v473_v13 = vmul.f32 %v1388_v11, %v470_v5  ;;  %v491_v14 = vadd.f32 %v1386_v6, %v490_v9  ;;  %vm478_vm12 = vweird.f32 %v1388_v11  ;;  %v1390_v44 = vpop.eup %1389 }
 0x4b7   :  { %vm479_vm0 = vmor %vm477_vm15, %vm478_vm12  ;;  %vm1189_vm12 = vcmask 1041408  }
 0x4b8   :  { %v474_v17 = vsub.f32 1.0, %v473_v13  ;;  %v495_v19 = vsel %vm494_vm11, %v1386_v6, %v491_v14 }
 0x4b9   :  { %v500_v41 = vsel %vm497_vm13, %v499_v38, %v495_v19  ;;  %vm1191_vm13 = vcmask 1043456  }
 0x4ba   :  { %v475_v31 = vmul.f32 %v1388_v11, %v474_v17  ;;  %v503_v48 = vsel %vm170_vm10, %v1390_v44, %v500_v41 }
 0x4bc   :  { %v476_v40 = vadd.f32 %v1388_v11, %v475_v31 }
 0x4be   :  { %v480_v46 = vsel %vm479_vm0, %v1388_v11, %v476_v40 }
 0x4bf   :  { %v485_v47 = vsel %vm482_vm1, %v484_v42, %v480_v46 }
 0x4c0   :  { %v508_v50 = vmul.f32 %v503_v48, %v485_v47  ;;  %v507_v51 = vmul.f32 %v505_v45, %v485_v47 }
 0x4c2   :  { %510 = vrot.lane.b32.xlu2 %v508_v50, %s1520_s13 }
 0x51c   :  { %v511_v55 = vpop.permute.xlu2 %510 }
 0x51d   :  { %v1900_v39 = vadd.f32 %v511_v55, %v507_v51 }
 0x51f   :  { %1391 = vtanh.f32 %v1900_v39  ;;  %v613_v46 = vrot.slane %v1900_v39, 6 }
 0x525   :  { %v1392_v43 = vpop.eup %1391 }
 0x526   :  { %v1903_v59 = vmul.f32 %v1392_v43, %v503_v48 }
 0x528   :  { %v517_v54 = vrot.slane %v1903_v59, 4 }
 0x52a   :  { %518 = vrot.lane.b32.xlu0 %v517_v54, %s1520_s13 }
 0x59c   :  { %v519_v60 = vpop.permute.xlu0 %518 }
 0x59d   :  { %1321 = vmatmul.msk.f32.vlgmr.msrb.gmra.mxu2 %vm190_vm4, %v519_v60  ;;  %1322 = vmatmul.msk.f32.vlgmr.msra.gmra.mxu0 %vm190_vm4, %v519_v60 }
 0x59e   :  { %955 = vmatpush.msrb.mxu2 %v1632_v20  ;;  %975 = vmatpush.msra.mxu0 %v1637_v21 }
 0x5a0   :  { %956 = vmatpush.msrb.mxu2 %v1642_v22  ;;  %976 = vmatpush.msra.mxu0 %v1649_v23 }
 0x5a2   :  { %957 = vmatpush.msrb.mxu2 %v1654_v24  ;;  %977 = vmatpush.msra.mxu0 %v1659_v25 }
 0x5a4   :  { %958 = vmatpush.msrb.mxu2 %v1668_v26  ;;  %978 = vmatpush.msra.mxu0 %v1677_v27 }
 0x5a6   :  { %959 = vmatpush.msrb.mxu2 %v1686_v28  ;;  %979 = vmatpush.msra.mxu0 %v1691_v29 }
 0x5a8   :  { %960 = vmatpush.msrb.mxu2 %v1696_v30  ;;  %980 = vmatpush.msra.mxu0 %v1707_v32 }
 0x5aa   :  { %961 = vmatpush.msrb.mxu2 %v1712_v33  ;;  %981 = vmatpush.msra.mxu0 %v1717_v34 }
 0x5ac   :  { %962 = vmatpush.msrb.mxu2 %v1726_v35  ;;  %982 = vmatpush.msra.mxu0 %v1731_v36 }
 0x61a   :  { %v559_v61 = vpop.f32.mrf.mxu0 }
 0x61b   :  { %v565_v62 = vrot.slane %v559_v61, 2  ;;  %v1173_v61 = vrot.slane %v1903_v59, 2 }
 0x61d   :  { %v569_v63 = vadd.f32 %v565_v62, %v1819_v52 }
 0x61f   :  { %v1324_v0 = vmul.f32 -1.442695, %v569_v63 }
 0x620   :  { %v539_v1 = vpop.f32.mrf.mxu2 }
 0x621   :  { %1393 = vpow2.f32 %v1324_v0  ;;  %v564_v2 = vrot.slane %v539_v1, 2  ;;  %v1190_v0 = vsel %vm1189_vm12, %v409_v58, %v1173_v61 }
 0x623   :  { %v568_v3 = vadd.f32 %v564_v2, %v1824_v57 }
 0x625   :  { %v1323_v4 = vmul.f32 -1.442695, %v568_v3 }
 0x627   :  { %v1394_v5 = vpop.eup %1393  ;;  %1395 = vpow2.f32 %v1323_v4 }
 0x628   :  { %v579_v6 = vadd.f32 1.0, %v1394_v5 }
 0x62a   :  { %1397 = vrcp.f32 %v579_v6  ;;  %v606_v17 = vand.u32 2147483648, %v579_v6  ;;  %vm600_vm3 = vweird.f32 %v579_v6  ;;  %v604_v18 = vand.u32 2147483647, %v579_v6 }
 0x62c   :  { %v607_v40 = vor.u32 1.1754944e-38, %v606_v17  ;;  %vm605_vm7 = vcmp.eq.f32.partialorder %v604_v18, 8.507059e+37 }
 0x62d   :  { %v1396_v7 = vpop.eup %1395 }
 0x62e   :  { %v578_v8 = vadd.f32 1.0, %v1396_v7 }
 0x630   :  { %v1398_v9 = vpop.eup %1397  ;;  %1399 = vrcp.f32 %v578_v8  ;;  %v591_v19 = vand.u32 2147483648, %v578_v8  ;;  %v589_v38 = vand.u32 2147483647, %v578_v8  ;;  %vm585_vm8 = vweird.f32 %v578_v8 }
 0x631   :  { %v596_v11 = vmul.f32 %v1398_v9, %v579_v6  ;;  %vm601_vm2 = vweird.f32 %v1398_v9  ;;  %1401 = vtanh.f32 %v569_v63 }
 0x632   :  { %vm602_vm5 = vmor %vm600_vm3, %vm601_vm2  ;;  %v592_v44 = vor.u32 1.1754944e-38, %v591_v19  ;;  %vm590_vm11 = vcmp.eq.f32.partialorder %v589_v38, 8.507059e+37 }
 0x633   :  { %v597_v13 = vsub.f32 1.0, %v596_v11 }
 0x635   :  { %v598_v14 = vmul.f32 %v1398_v9, %v597_v13 }
 0x636   :  { %v1400_v15 = vpop.eup %1399 }
 0x637   :  { %v581_v52 = vmul.f32 %v1400_v15, %v578_v8  ;;  %v599_v16 = vadd.f32 %v1398_v9, %v598_v14  ;;  %vm586_vm6 = vweird.f32 %v1400_v15  ;;  %v1402_v45 = vpop.eup %1401 }
 0x638   :  { %vm587_vm9 = vmor %vm585_vm8, %vm586_vm6  ;;  %vm1193_vm8 = vcmask 1045504  }
 0x639   :  { %v582_v57 = vsub.f32 1.0, %v581_v52  ;;  %v603_v31 = vsel %vm602_vm5, %v1398_v9, %v599_v16 }
 0x63a   :  { %v608_v42 = vsel %vm605_vm7, %v607_v40, %v603_v31 }
 0x63b   :  { %v583_v37 = vmul.f32 %v1400_v15, %v582_v57  ;;  %v611_v50 = vsel %vm170_vm10, %v1402_v45, %v608_v42 }
 0x63d   :  { %v584_v41 = vadd.f32 %v1400_v15, %v583_v37 }
 0x63f   :  { %v588_v47 = vsel %vm587_vm9, %v1400_v15, %v584_v41 }
 0x640   :  { %v593_v48 = vsel %vm590_vm11, %v592_v44, %v588_v47 }
 0x641   :  { %v616_v51 = vmul.f32 %v611_v50, %v593_v48  ;;  %v615_v55 = vmul.f32 %v613_v46, %v593_v48 }
 0x643   :  { %618 = vrot.lane.b32.xlu1 %v616_v51, %s1520_s13 }
 0x6b5   :  { %v619_v43 = vpop.permute.xlu1 %618 }
 0x6b6   :  { %v1931_v54 = vadd.f32 %v619_v43, %v615_v55 }
 0x6b8   :  { %1403 = vtanh.f32 %v1931_v54  ;;  %v715_v15 = vrot.slane %v1931_v54, 6 }
 0x6be   :  { %v1404_v60 = vpop.eup %1403 }
 0x6bf   :  { %v623_v62 = vmul.f32 %v1404_v60, %v611_v50 }
 0x6c1   :  { %v625_v39 = vrot.slane %v623_v62, 6  ;;  %v1175_v63 = vrot.slane %v623_v62, 2 }
 0x6c3   :  { %626 = vrot.lane.b32.xlu2 %v625_v39, %s1520_s13  ;;  %v1940_v1 = vsel %vm1191_vm13, %v1190_v0, %v1175_v63 }
 0x71d   :  { %v627_v2 = vpop.permute.xlu2 %626 }
 0x71e   :  { %1325 = vmatmul.msk.f32.vlgmr.msrb.gmra.mxu3 %vm190_vm4, %v627_v2  ;;  %1326 = vmatmul.msk.f32.vlgmr.msrb.gmra.mxu1 %vm190_vm4, %v627_v2 }
 0x71f   :  { %1063 = vmatpush.msrb.mxu3 %v1632_v20  ;;  %1083 = vmatpush.msrb.mxu1 %v1637_v21 }
 0x721   :  { %1064 = vmatpush.msrb.mxu3 %v1642_v22  ;;  %1084 = vmatpush.msrb.mxu1 %v1649_v23 }
 0x723   :  { %1065 = vmatpush.msrb.mxu3 %v1654_v24  ;;  %1085 = vmatpush.msrb.mxu1 %v1659_v25 }
 0x725   :  { %1066 = vmatpush.msrb.mxu3 %v1668_v26  ;;  %1086 = vmatpush.msrb.mxu1 %v1677_v27 }
 0x727   :  { %1067 = vmatpush.msrb.mxu3 %v1686_v28  ;;  %1087 = vmatpush.msrb.mxu1 %v1691_v29 }
 0x729   :  { %1068 = vmatpush.msrb.mxu3 %v1696_v30  ;;  %1088 = vmatpush.msrb.mxu1 %v1707_v32 }
 0x72b   :  { %1069 = vmatpush.msrb.mxu3 %v1712_v33  ;;  %1089 = vmatpush.msrb.mxu1 %v1717_v34 }
 0x72d   :  { %1070 = vmatpush.msrb.mxu3 %v1726_v35  ;;  %1090 = vmatpush.msrb.mxu1 %v1731_v36 }
 0x79b   :  { %v667_v20 = vpop.f32.mrf.mxu1 }
 0x79c   :  { %v671_v21 = vadd.f32 %v667_v20, %v1821_v53 }
 0x79e   :  { %v1328_v22 = vmul.f32 -1.442695, %v671_v21 }
 0x7a0   :  { %1405 = vpow2.f32 %v1328_v22 }
 0x7a1   :  { %v647_v23 = vpop.f32.mrf.mxu3 }
 0x7a2   :  { %v670_v24 = vadd.f32 %v647_v23, %v1817_v49 }
 0x7a4   :  { %v1327_v25 = vmul.f32 -1.442695, %v670_v24 }
 0x7a6   :  { %v1406_v26 = vpop.eup %1405  ;;  %1407 = vpow2.f32 %v1327_v25 }
 0x7a7   :  { %v681_v27 = vadd.f32 1.0, %v1406_v26 }
 0x7a9   :  { %1409 = vrcp.f32 %v681_v27  ;;  %v708_v58 = vand.u32 2147483648, %v681_v27  ;;  %vm702_vm0 = vweird.f32 %v681_v27  ;;  %v706_v59 = vand.u32 2147483647, %v681_v27 }
 0x7ab   :  { %v709_v8 = vor.u32 1.1754944e-38, %v708_v58  ;;  %vm707_vm3 = vcmp.eq.f32.partialorder %v706_v59, 8.507059e+37 }
 0x7ac   :  { %v1408_v28 = vpop.eup %1407 }
 0x7ad   :  { %v680_v29 = vadd.f32 1.0, %v1408_v28 }
 0x7af   :  { %v1410_v30 = vpop.eup %1409  ;;  %1411 = vrcp.f32 %v680_v29  ;;  %v693_v4 = vand.u32 2147483648, %v680_v29  ;;  %v691_v7 = vand.u32 2147483647, %v680_v29  ;;  %vm687_vm5 = vweird.f32 %v680_v29 }
 0x7b0   :  { %v698_v32 = vmul.f32 %v1410_v30, %v681_v27  ;;  %vm703_vm15 = vweird.f32 %v1410_v30  ;;  %1413 = vtanh.f32 %v671_v21 }
 0x7b1   :  { %vm704_vm1 = vmor %vm702_vm0, %vm703_vm15  ;;  %v694_v13 = vor.u32 1.1754944e-38, %v693_v4  ;;  %vm692_vm7 = vcmp.eq.f32.partialorder %v691_v7, 8.507059e+37 }
 0x7b2   :  { %v699_v33 = vsub.f32 1.0, %v698_v32 }
 0x7b4   :  { %v700_v34 = vmul.f32 %v1410_v30, %v699_v33 }
 0x7b5   :  { %v1412_v35 = vpop.eup %1411 }
 0x7b6   :  { %v683_v36 = vmul.f32 %v1412_v35, %v680_v29  ;;  %v701_v56 = vadd.f32 %v1410_v30, %v700_v34  ;;  %vm688_vm2 = vweird.f32 %v1412_v35  ;;  %v1414_v14 = vpop.eup %1413 }
 0x7b7   :  { %vm689_vm6 = vmor %vm687_vm5, %vm688_vm2 }
 0x7b8   :  { %v684_v3 = vsub.f32 1.0, %v683_v36  ;;  %v705_v5 = vsel %vm704_vm1, %v1410_v30, %v701_v56 }
 0x7b9   :  { %v710_v11 = vsel %vm707_vm3, %v709_v8, %v705_v5 }
 0x7ba   :  { %v685_v6 = vmul.f32 %v1412_v35, %v684_v3  ;;  %v713_v17 = vsel %vm170_vm10, %v1414_v14, %v710_v11 }
 0x7bc   :  { %v686_v9 = vadd.f32 %v1412_v35, %v685_v6 }
 0x7be   :  { %v690_v52 = vsel %vm689_vm6, %v1412_v35, %v686_v9 }
 0x7bf   :  { %v695_v16 = vsel %vm692_vm7, %v694_v13, %v690_v52 }
 0x7c0   :  { %v718_v18 = vmul.f32 %v713_v17, %v695_v16  ;;  %v717_v57 = vmul.f32 %v715_v15, %v695_v16 }
 0x7c2   :  { %720 = vrot.lane.b32.xlu0 %v718_v18, %s1520_s13 }
 0x834   :  { %v721_v19 = vpop.permute.xlu0 %720 }
 0x835   :  { %v723_v31 = vadd.f32 %v721_v19, %v717_v57 }
 0x837   :  { %1415 = vtanh.f32 %v723_v31  ;;  %v822_v34 = vrot.slane %v723_v31, 6 }
 0x83d   :  { %v1416_v37 = vpop.eup %1415 }
 0x83e   :  { %v725_v38 = vmul.f32 %v1416_v37, %v713_v17 }
 0x840   :  { %727 = vrot.lane.b32.xlu1 %v725_v38, %s1520_s13  ;;  %v1177_v40 = vrot.slane %v725_v38, 2 }
 0x842   :  { %v1969_v41 = vsel %vm1193_vm8, %v1940_v1, %v1177_v40 }
 0x8b2   :  { %v728_v42 = vpop.permute.xlu1 %727 }
 0x8b3   :  { %1329 = vmatmul.msk.f32.vlgmr.msra.gmra.mxu2 %vm190_vm4, %v728_v42  ;;  %1330 = vmatmul.msk.f32.vlgmr.msrb.gmra.mxu0 %vm190_vm4, %v728_v42 }
 0x930   :  { %v768_v44 = vpop.f32.mrf.mxu0 }
 0x931   :  { %v774_v45 = vrot.slane %v768_v44, 6 }
 0x933   :  { %v778_v46 = vadd.f32 %v774_v45, %v1821_v53 }
 0x935   :  { %v1332_v47 = vmul.f32 -1.442695, %v778_v46 }
 0x936   :  { %v748_v48 = vpop.f32.mrf.mxu2 }
 0x937   :  { %1417 = vpow2.f32 %v1332_v47  ;;  %v773_v50 = vrot.slane %v748_v48, 6 }
 0x939   :  { %v777_v51 = vadd.f32 %v773_v50, %v1817_v49 }
 0x93b   :  { %v1331_v55 = vmul.f32 -1.442695, %v777_v51 }
 0x93d   :  { %v1418_v43 = vpop.eup %1417  ;;  %1419 = vpow2.f32 %v1331_v55 }
 0x93e   :  { %v788_v54 = vadd.f32 1.0, %v1418_v43 }
 0x940   :  { %1421 = vrcp.f32 %v788_v54  ;;  %v815_v21 = vand.u32 2147483648, %v788_v54  ;;  %vm809_vm11 = vweird.f32 %v788_v54  ;;  %v813_v22 = vand.u32 2147483647, %v788_v54 }
 0x942   :  { %v816_v28 = vor.u32 1.1754944e-38, %v815_v21  ;;  %vm814_vm1 = vcmp.eq.f32.partialorder %v813_v22, 8.507059e+37 }
 0x943   :  { %v1420_v60 = vpop.eup %1419 }
 0x944   :  { %v787_v61 = vadd.f32 1.0, %v1420_v60 }
 0x946   :  { %v1422_v62 = vpop.eup %1421  ;;  %1423 = vrcp.f32 %v787_v61  ;;  %v800_v24 = vand.u32 2147483648, %v787_v61  ;;  %v798_v27 = vand.u32 2147483647, %v787_v61  ;;  %vm794_vm2 = vweird.f32 %v787_v61 }
 0x947   :  { %v805_v39 = vmul.f32 %v1422_v62, %v788_v54  ;;  %vm810_vm9 = vweird.f32 %v1422_v62  ;;  %1425 = vtanh.f32 %v778_v46 }
 0x948   :  { %vm811_vm15 = vmor %vm809_vm11, %vm810_vm9  ;;  %v801_v32 = vor.u32 1.1754944e-38, %v800_v24  ;;  %vm799_vm5 = vcmp.eq.f32.partialorder %v798_v27, 8.507059e+37 }
 0x949   :  { %v806_v63 = vsub.f32 1.0, %v805_v39 }
 0x94b   :  { %v807_v0 = vmul.f32 %v1422_v62, %v806_v63 }
 0x94c   :  { %v1424_v1 = vpop.eup %1423 }
 0x94d   :  { %v790_v2 = vmul.f32 %v1424_v1, %v787_v61  ;;  %v808_v20 = vadd.f32 %v1422_v62, %v807_v0  ;;  %vm795_vm0 = vweird.f32 %v1424_v1  ;;  %v1426_v33 = vpop.eup %1425 }
 0x94e   :  { %vm796_vm3 = vmor %vm794_vm2, %vm795_vm0 }
 0x94f   :  { %v791_v23 = vsub.f32 1.0, %v790_v2  ;;  %v812_v25 = vsel %vm811_vm15, %v1422_v62, %v808_v20 }
 0x950   :  { %v817_v30 = vsel %vm814_vm1, %v816_v28, %v812_v25 }
 0x951   :  { %v792_v26 = vmul.f32 %v1424_v1, %v791_v23  ;;  %v820_v56 = vsel %vm170_vm10, %v1426_v33, %v817_v30 }
 0x953   :  { %v793_v29 = vadd.f32 %v1424_v1, %v792_v26 }
 0x955   :  { %v797_v35 = vsel %vm796_vm3, %v1424_v1, %v793_v29 }
 0x956   :  { %v802_v36 = vsel %vm799_vm5, %v801_v32, %v797_v35 }
 0x957   :  { %v825_v58 = vmul.f32 %v820_v56, %v802_v36  ;;  %v824_v59 = vmul.f32 %v822_v34, %v802_v36 }
 0x959   :  { %827 = vrot.lane.b32.xlu2 %v825_v58, %s1520_s13 }
 0x9b3   :  { %v828_v3 = vpop.permute.xlu2 %827 }
 0x9b4   :  { %v830_v4 = vadd.f32 %v828_v3, %v824_v59 }
 0x9b6   :  { %1427 = vtanh.f32 %v830_v4  ;;  %v930_v0 = vrot.slane %v830_v4, 6 }
 0x9bc   :  { %v1428_v5 = vpop.eup %1427 }
 0x9bd   :  { %v1978_v6 = vmul.f32 %v1428_v5, %v820_v56 }
 0x9bf   :  { %v834_v7 = vrot.slane %v1978_v6, 2 }
 0x9c1   :  { %835 = vrot.lane.b32.xlu0 %v834_v7, %s1520_s13 }
 0xa33   :  { %v836_v8 = vpop.permute.xlu0 %835 }
 0xa34   :  { %1333 = vmatmul.msk.f32.vlgmr.msra.gmra.mxu3 %vm190_vm4, %v836_v8  ;;  %1334 = vmatmul.msk.f32.vlgmr.msra.gmra.mxu1 %vm190_vm4, %v836_v8 }
 0xab1   :  { %v876_v9 = vpop.f32.mrf.mxu1 }
 0xab2   :  { %v882_v11 = vrot.slane %v876_v9, 4 }
 0xab4   :  { %v886_v13 = vadd.f32 %v882_v11, %v1821_v53 }
 0xab6   :  { %v1336_v14 = vmul.f32 -1.442695, %v886_v13 }
 0xab7   :  { %v856_v15 = vpop.f32.mrf.mxu3 }
 0xab8   :  { %1429 = vpow2.f32 %v1336_v14  ;;  %v881_v52 = vrot.slane %v856_v15, 4 }
 0xaba   :  { %v885_v16 = vadd.f32 %v881_v52, %v1817_v49 }
 0xabc   :  { %v1335_v17 = vmul.f32 -1.442695, %v885_v16 }
 0xabe   :  { %v1430_v18 = vpop.eup %1429  ;;  %1431 = vpow2.f32 %v1335_v17 }
 0xabf   :  { %v896_v57 = vadd.f32 1.0, %v1430_v18 }
 0xac1   :  { %1433 = vrcp.f32 %v896_v57  ;;  %v923_v47 = vand.u32 2147483648, %v896_v57  ;;  %vm917_vm7 = vweird.f32 %v896_v57  ;;  %v921_v48 = vand.u32 2147483647, %v896_v57 }
 0xac3   :  { %v924_v60 = vor.u32 1.1754944e-38, %v923_v47  ;;  %vm922_vm15 = vcmp.eq.f32.partialorder %v921_v48, 8.507059e+37 }
 0xac4   :  { %v1432_v19 = vpop.eup %1431 }
 0xac5   :  { %v895_v31 = vadd.f32 1.0, %v1432_v19 }
 0xac7   :  { %v1434_v37 = vpop.eup %1433  ;;  %1435 = vrcp.f32 %v895_v31  ;;  %v908_v51 = vand.u32 2147483648, %v895_v31  ;;  %v906_v54 = vand.u32 2147483647, %v895_v31  ;;  %vm902_vm0 = vweird.f32 %v895_v31 }
 0xac8   :  { %v913_v38 = vmul.f32 %v1434_v37, %v896_v57  ;;  %vm918_vm6 = vweird.f32 %v1434_v37  ;;  %1437 = vtanh.f32 %v886_v13 }
 0xac9   :  { %vm919_vm9 = vmor %vm917_vm7, %vm918_vm6  ;;  %v909_v39 = vor.u32 1.1754944e-38, %v908_v51  ;;  %vm907_vm2 = vcmp.eq.f32.partialorder %v906_v54, 8.507059e+37 }
 0xaca   :  { %v914_v40 = vsub.f32 1.0, %v913_v38 }
 0xacc   :  { %v915_v42 = vmul.f32 %v1434_v37, %v914_v40 }
 0xacd   :  { %v1436_v44 = vpop.eup %1435 }
 0xace   :  { %v898_v45 = vmul.f32 %v1436_v44, %v895_v31  ;;  %v916_v46 = vadd.f32 %v1434_v37, %v915_v42  ;;  %vm903_vm11 = vweird.f32 %v1436_v44  ;;  %v1438_v63 = vpop.eup %1437 }
 0xacf   :  { %vm904_vm1 = vmor %vm902_vm0, %vm903_vm11 }
 0xad0   :  { %v899_v50 = vsub.f32 1.0, %v898_v45  ;;  %v920_v55 = vsel %vm919_vm9, %v1434_v37, %v916_v46 }
 0xad1   :  { %v925_v62 = vsel %vm922_vm15, %v924_v60, %v920_v55 }
 0xad2   :  { %v900_v43 = vmul.f32 %v1436_v44, %v899_v50  ;;  %v928_v20 = vsel %vm170_vm10, %v1438_v63, %v925_v62 }
 0xad4   :  { %v901_v61 = vadd.f32 %v1436_v44, %v900_v43 }
 0xad6   :  { %v905_v1 = vsel %vm904_vm1, %v1436_v44, %v901_v61 }
 0xad7   :  { %v910_v2 = vsel %vm907_vm2, %v909_v39, %v905_v1 }
 0xad8   :  { %v933_v21 = vmul.f32 %v928_v20, %v910_v2  ;;  %v932_v22 = vmul.f32 %v930_v0, %v910_v2 }
 0xada   :  { %935 = vrot.lane.b32.xlu1 %v933_v21, %s1520_s13 }
 0xb4c   :  { %v936_v23 = vpop.permute.xlu1 %935 }
 0xb4d   :  { %v938_v24 = vadd.f32 %v936_v23, %v932_v22 }
 0xb4f   :  { %1439 = vtanh.f32 %v938_v24  ;;  %v1038_v45 = vrot.slane %v938_v24, 6 }
 0xb55   :  { %v1440_v25 = vpop.eup %1439 }
 0xb56   :  { %v1991_v26 = vmul.f32 %v1440_v25, %v928_v20 }
 0xb58   :  { %v942_v27 = vrot.slane %v1991_v26, 4  ;;  %v1180_v60 = vrot.slane %v1991_v26, 2 }
 0xb5a   :  { %943 = vrot.lane.b32.xlu2 %v942_v27, %s1520_s13  ;;  %v1195_v63 = vsel %vm1189_vm12, %v834_v7, %v1180_v60  ;;  %v1205_v27 = vld [vmem:[%s2096_s7 + $0x38] sm:$0xff] }
 0xb5b   :  { %1228 = vmatpush.msra.mxu2 %v1205_v27 }
 0xbb4   :  { %v944_v28 = vpop.permute.xlu2 %943 }
 0xbb5   :  { %1337 = vmatmul.msk.f32.vlgmr.msrb.gmra.mxu2 %vm190_vm4, %v944_v28  ;;  %1338 = vmatmul.msk.f32.vlgmr.msra.gmra.mxu0 %vm190_vm4, %v944_v28  ;;  %v1204_v28 = vld [vmem:[%s2096_s7 + $0x30] sm:$0xff] }
 0xbb6   :  { %1229 = vmatpush.msra.mxu2 %v1204_v28 }
 0xc32   :  { %v984_v29 = vpop.f32.mrf.mxu0 }
 0xc33   :  { %v990_v30 = vrot.slane %v984_v29, 2  ;;  %v1203_v29 = vld [vmem:[%s2096_s7 + $0x28] sm:$0xff] }
 0xc34   :  { %1230 = vmatpush.msra.mxu2 %v1203_v29 }
 0xc35   :  { %v994_v32 = vadd.f32 %v990_v30, %v1821_v53  ;;  %v1202_v30 = vld [vmem:[%s2096_s7 + $0x20] sm:$0xff] }
 0xc36   :  { %1231 = vmatpush.msra.mxu2 %v1202_v30 }
 0xc37   :  { %v1340_v33 = vmul.f32 -1.442695, %v994_v32 }
 0xc38   :  { %v964_v34 = vpop.f32.mrf.mxu2 }
 0xc39   :  { %1441 = vpow2.f32 %v1340_v33  ;;  %v989_v35 = vrot.slane %v964_v34, 2 }
 0xc3b   :  { %v993_v36 = vadd.f32 %v989_v35, %v1817_v49 }
 0xc3d   :  { %v1339_v56 = vmul.f32 -1.442695, %v993_v36 }
 0xc3f   :  { %v1442_v58 = vpop.eup %1441  ;;  %1443 = vpow2.f32 %v1339_v56 }
 0xc40   :  { %v1004_v59 = vadd.f32 1.0, %v1442_v58 }
 0xc42   :  { %1445 = vrcp.f32 %v1004_v59  ;;  %v1031_v52 = vand.u32 2147483648, %v1004_v59  ;;  %vm1025_vm5 = vweird.f32 %v1004_v59  ;;  %v1029_v16 = vand.u32 2147483647, %v1004_v59 }
 0xc44   :  { %v1032_v37 = vor.u32 1.1754944e-38, %v1031_v52  ;;  %vm1030_vm9 = vcmp.eq.f32.partialorder %v1029_v16, 8.507059e+37 }
 0xc45   :  { %v1444_v3 = vpop.eup %1443 }
 0xc46   :  { %v1003_v4 = vadd.f32 1.0, %v1444_v3 }
 0xc48   :  { %v1446_v5 = vpop.eup %1445  ;;  %1447 = vrcp.f32 %v1003_v4  ;;  %v1016_v18 = vand.u32 2147483648, %v1003_v4  ;;  %v1014_v31 = vand.u32 2147483647, %v1003_v4  ;;  %vm1010_vm11 = vweird.f32 %v1003_v4 }
 0xc49   :  { %v1021_v8 = vmul.f32 %v1446_v5, %v1004_v59  ;;  %vm1026_vm3 = vweird.f32 %v1446_v5  ;;  %1449 = vtanh.f32 %v994_v32 }
 0xc4a   :  { %vm1027_vm6 = vmor %vm1025_vm5, %vm1026_vm3  ;;  %v1017_v42 = vor.u32 1.1754944e-38, %v1016_v18  ;;  %vm1015_vm0 = vcmp.eq.f32.partialorder %v1014_v31, 8.507059e+37  ;;  %v1201_v31 = vld [vmem:[%s2096_s7 + $0x18] sm:$0xff] }
 0xc4b   :  { %v1022_v9 = vsub.f32 1.0, %v1021_v8  ;;  %1232 = vmatpush.msra.mxu2 %v1201_v31 }
 0xc4d   :  { %v1023_v11 = vmul.f32 %v1446_v5, %v1022_v9 }
 0xc4e   :  { %v1448_v13 = vpop.eup %1447 }
 0xc4f   :  { %v1006_v14 = vmul.f32 %v1448_v13, %v1003_v4  ;;  %v1024_v15 = vadd.f32 %v1446_v5, %v1023_v11  ;;  %vm1011_vm7 = vweird.f32 %v1448_v13  ;;  %v1450_v44 = vpop.eup %1449 }
 0xc50   :  { %vm1012_vm15 = vmor %vm1010_vm11, %vm1011_vm7 }
 0xc51   :  { %v1007_v17 = vsub.f32 1.0, %v1006_v14  ;;  %v1028_v57 = vsel %vm1027_vm6, %v1446_v5, %v1024_v15 }
 0xc52   :  { %v1033_v40 = vsel %vm1030_vm9, %v1032_v37, %v1028_v57  ;;  %v1200_v37 = vld [vmem:[%s2096_s7 + $0x10] sm:$0xff] }
 0xc53   :  { %v1008_v19 = vmul.f32 %v1448_v13, %v1007_v17  ;;  %v1036_v48 = vsel %vm170_vm10, %v1450_v44, %v1033_v40  ;;  %1233 = vmatpush.msra.mxu2 %v1200_v37 }
 0xc55   :  { %v1009_v38 = vadd.f32 %v1448_v13, %v1008_v19  ;;  %1234 = vmatpush.msra.mxu2 %v1199_v10 }
 0xc57   :  { %v1013_v46 = vsel %vm1012_vm15, %v1448_v13, %v1009_v38  ;;  %v1198_v38 = vld [vmem:[%s2096_s7] sm:$0xff] }
 0xc58   :  { %v1018_v47 = vsel %vm1015_vm0, %v1017_v42, %v1013_v46  ;;  %1235 = vmatpush.msra.mxu2 %v1198_v38 }
 0xc59   :  { %v1041_v50 = vmul.f32 %v1036_v48, %v1018_v47  ;;  %v1040_v51 = vmul.f32 %v1038_v45, %v1018_v47 }
 0xc5b   :  { %1043 = vrot.lane.b32.xlu0 %v1041_v50, %s1520_s13 }
 0xccd   :  { %v1044_v55 = vpop.permute.xlu0 %1043 }
 0xcce   :  { %v2002_v43 = vadd.f32 %v1044_v55, %v1040_v51 }
 0xcd0   :  { %1451 = vtanh.f32 %v2002_v43  ;;  %v1155_v60 = vrot.slane %v2002_v43, 6 }
 0xcd6   :  { %v1452_v54 = vpop.eup %1451 }
 0xcd7   :  { %v1048_v61 = vmul.f32 %v1452_v54, %v1036_v48  ;;  %v1356_v54 = vld [vmem:[%s2097_s8] ss:$0 sm:$0xff]  ;;  %s1521_s8 = smov 96  }
 0xcd9   :  { %v1050_v62 = vrot.slane %v1048_v61, 6  ;;  %v1182_v39 = vrot.slane %v1048_v61, 2 }
 0xcdb   :  { %1051 = vrot.lane.b32.xlu1 %v1050_v62, %s1520_s13  ;;  %v2011_v0 = vsel %vm1191_vm13, %v1195_v63, %v1182_v39 }
 0xd4d   :  { %v2013_v1 = vpop.permute.xlu1 %1051 }
 0xd4e   :  { %1341 = vmatmul.msk.f32.vlgmr.msrb.gmra.mxu3 %vm190_vm4, %v2013_v1  ;;  %1342 = vmatmul.msk.f32.vlgmr.msrb.gmra.mxu1 %vm190_vm4, %v2013_v1 }
 0xdcb   :  { %v1092_v2 = vpop.f32.mrf.mxu1 }
 0xdcc   :  { %v1098_v20 = vrot.slane %v1092_v2, 2 }
 0xdce   :  { %v1102_v21 = vadd.f32 %v1098_v20, %v1821_v53 }
 0xdd0   :  { %v1344_v6 = vmul.f32 -1.442695, %v1102_v21 }
 0xdd1   :  { %v1072_v22 = vpop.f32.mrf.mxu3 }
 0xdd2   :  { %1453 = vpow2.f32 %v1344_v6  ;;  %v1097_v7 = vrot.slane %v1072_v22, 2 }
 0xdd4   :  { %v1101_v23 = vadd.f32 %v1097_v7, %v1817_v49 }
 0xdd6   :  { %v1343_v24 = vmul.f32 -1.442695, %v1101_v23 }
 0xdd8   :  { %v1454_v25 = vpop.eup %1453  ;;  %1455 = vpow2.f32 %v1343_v24 }
 0xdd9   :  { %v1112_v26 = vadd.f32 1.0, %v1454_v25 }
 0xddb   :  { %1457 = vrcp.f32 %v1112_v26  ;;  %v1139_v59 = vand.u32 2147483648, %v1112_v26  ;;  %vm1133_vm13 = vweird.f32 %v1112_v26  ;;  %v1137_v3 = vand.u32 2147483647, %v1112_v26 }
 0xddd   :  { %v1140_v13 = vor.u32 1.1754944e-38, %v1139_v59  ;;  %vm1138_vm3 = vcmp.eq.f32.partialorder %v1137_v3, 8.507059e+37 }
 0xdde   :  { %v1456_v53 = vpop.eup %1455 }
 0xddf   :  { %v1111_v49 = vadd.f32 1.0, %v1456_v53 }
 0xde1   :  { %v1458_v32 = vpop.eup %1457  ;;  %1459 = vrcp.f32 %v1111_v49  ;;  %v1124_v5 = vand.u32 2147483648, %v1111_v49  ;;  %v1122_v11 = vand.u32 2147483647, %v1111_v49  ;;  %vm1118_vm5 = vweird.f32 %v1111_v49 }
 0xde2   :  { %v1129_v33 = vmul.f32 %v1458_v32, %v1112_v26  ;;  %vm1134_vm12 = vweird.f32 %v1458_v32  ;;  %1461 = vtanh.f32 %v1102_v21 }
 0xde3   :  { %vm1135_vm1 = vmor %vm1133_vm13, %vm1134_vm12  ;;  %v1125_v52 = vor.u32 1.1754944e-38, %v1124_v5  ;;  %vm1123_vm7 = vcmp.eq.f32.partialorder %v1122_v11, 8.507059e+37 }
 0xde4   :  { %v1130_v34 = vsub.f32 1.0, %v1129_v33 }
 0xde6   :  { %v1131_v35 = vmul.f32 %v1458_v32, %v1130_v34 }
 0xde7   :  { %v1460_v36 = vpop.eup %1459 }
 0xde8   :  { %v1114_v56 = vmul.f32 %v1460_v36, %v1111_v49  ;;  %v1132_v58 = vadd.f32 %v1458_v32, %v1131_v35  ;;  %vm1119_vm2 = vweird.f32 %v1460_v36  ;;  %v1462_v16 = vpop.eup %1461 }
 0xde9   :  { %vm1120_vm6 = vmor %vm1118_vm5, %vm1119_vm2 }
 0xdea   :  { %v1115_v4 = vsub.f32 1.0, %v1114_v56  ;;  %v1136_v8 = vsel %vm1135_vm1, %v1458_v32, %v1132_v58 }
 0xdeb   :  { %v1141_v15 = vsel %vm1138_vm3, %v1140_v13, %v1136_v8 }
 0xdec   :  { %v1116_v9 = vmul.f32 %v1460_v36, %v1115_v4  ;;  %v1144_v57 = vsel %vm170_vm10, %v1462_v16, %v1141_v15  ;;  %vm1245_vm10 = vcmask 254976  }
 0xdee   :  { %v1117_v14 = vadd.f32 %v1460_v36, %v1116_v9 }
 0xdf0   :  { %v1121_v17 = vsel %vm1120_vm6, %v1460_v36, %v1117_v14 }
 0xdf1   :  { %v1126_v18 = vsel %vm1123_vm7, %v1125_v52, %v1121_v17 }
 0xdf2   :  { %v1146_v19 = vmul.f32 %v1144_v57, %v1126_v18 }
 0xdf4   :  { %1148 = vrot.lane.b32.xlu2 %v1146_v19, %s1520_s13 }
 0xdfc   :  { %1212 = vrot.lane.b32.xlu2 %v1969_v41, %s1520_s13  ;;  %v1145_v41 = vmul.f32 %v1126_v18, %v2002_v43 }
 0xe4e   :  { %v1149_v40 = vpop.permute.xlu2 %1148 }
 0xe4f   :  { %v1151_v42 = vadd.f32 %v1149_v40, %v1145_v41 }
 0xe51   :  { %1463 = vtanh.f32 %v1151_v42  ;;  %v1160_v44 = vrot.slane %v1151_v42, 6 }
 0xe53   :  { %1161 = vrot.lane.b32.xlu2 %v1160_v44, %s1520_s13 }
 0xe56   :  { %v1213_v45 = vpop.permute.xlu2 %1212 }
 0xe57   :  { %v1464_v46 = vpop.eup %1463  ;;  %1345 = vmatmul.msk.f32.vlgmr.msra.gmra.mxu2 %vm190_vm4, %v1213_v45 }
 0xe58   :  { %v1153_v47 = vmul.f32 %v1464_v46, %v1144_v57 }
 0xe5a   :  { %v1167_v48 = vrot.slane %v1153_v47, 6 }
 0xe5c   :  { %1168 = vrot.lane.b32.xlu0 %v1167_v48, %s1520_s13 }
 0xece   :  { %v1169_v50 = vpop.permute.xlu0 %1168 }
 0xecf   :  { %v1171_v51 = vsel %vm173_vm14, %v2013_v1, %v1169_v50  ;;  %v1162_v1 = vpop.permute.xlu2 %1161 }
 0xed0   :  { %1246 = vst.msk [vmem:[#allocation2] sm:$0x3] %vm1245_vm10, %v1171_v51  ;;  %v1185_v55 = vrot.slane %v1171_v51, 2 }
 0xed2   :  { %1186 = vrot.lane.b32.xlu1 %v1185_v55, %s1520_s13 }
 0xeda   :  { %1156 = vrot.lane.b32.xlu1 %v1155_v60, %s1520_s13  ;;  %v1237_v61 = vpop.f32.mrf.mxu2 }
 0xedb   :  { %v1238_v62 = vadd.f32 %v1356_v54, %v1237_v61 }
 0xedd   :  { %1243 = vst [vmem:[%s2098_s9] sm:$0xff] %v1238_v62 }
 0xf44   :  { %v1187_v39 = vpop.permute.xlu1 %1186 }
 0xf45   :  { %v1197_v63 = vsel %vm1193_vm8, %v2011_v0, %v1187_v39 }
 0xf46   :  { %1214 = vrot.lane.b32.xlu0 %v1197_v63, %s1520_s13  ;;  %s1523_s13 = smov [#allocation4]  }
 0xf47   :  { %s1278_s4 = sshll.u32 %s1523_s13, 4  ;;  %s1279_s4 = int_to_ptr.vmem [resolvable:$true] %s1278_s4 }
 0xf4c   :  { %v1157_v2 = vpop.permute.xlu1 %1156 }
 0xf4d   :  { %v1164_v20 = vsel %vm173_vm14, %v1157_v2, %v1162_v1 }
 0xf4e   :  { %1247 = vrot.lane.b32.xlu0 %v1171_v51, %s1521_s8  ;;  %1254 = vrot.lane.b32.xlu1 %v1164_v20, %s1521_s8  ;;  %1252 = vst.msk [vmem:[#allocation4] sm:$0x3] %vm1245_vm10, %v1164_v20 }
 0xfb8   :  { %v1215_v43 = vpop.permute.xlu0 %1214 }
 0xfb9   :  { %1346 = vmatmul.msk.f32.gmra.mxu2 %vm190_vm4, %v1215_v43 }
 0xfc0   :  { %v1248_v0 = vpop.permute.xlu0 %1247  ;;  %v1255_v21 = vpop.permute.xlu1 %1254 }
 0xfc1   :  { %1251 = vst.msk [vmem:[#allocation2 + $0x2] sm:$0x3] %vm1245_vm10, %v1248_v0 }
 0xfc2   :  { %1258 = vst.msk [vmem:[#allocation4 + $0x2] sm:$0x3] %vm1245_vm10, %v1255_v21  ;;  %1273 = dma.vmem_to_hbm [thread:$0]  %s1266_s6, 64, %s1268_s0, [#allocation3], %s1518_s14, %s1518_s14, %s1524_s18  }
 0xfc3   :  { %1286 = dma.vmem_to_hbm [thread:$0]  %s1279_s4, 64, %s1281_s17, [#allocation5], %s1518_s14, %s1518_s14, %s1524_s18  }
0x103c   :  { %v1240_v12 = vpop.f32.mrf.mxu2 }
0x103d   :  { %v1241_v6 = vadd.f32 %v1356_v54, %v1240_v12 }
0x103f   :  { %1244 = vst [vmem:[%s2098_s9 + $0x8] sm:$0xff] %v1241_v6 }
0x1040   :  { %1513 = dma.done.wait [#allocation3], 64  }
0x1041   :  { %1514 = vsyncadd [#allocation3], 4294967232 }
0x1042   :  { %1515 = dma.done.wait [#allocation5], 64  }
0x1043   :  { %1516 = vsyncadd [#allocation5], 4294967232 }
0x1044   :  { %1297 = vsyncpa [#allocation3], 1 }
0x1045   :  { %1298 = vsyncpa [#allocation5], 1 }

</bundles_post_ra>
